<compile_context>
chip_gen: v7x
topology: tpu7x:2x2x1
jax: 0.10.0
libtpu: 0.0.40
codegen_flags: <defaults>
</compile_context>

<pallas_src>
import functools

import jax
import jax.numpy as jnp
from jax import lax
from jax.experimental import pallas as pl
from jax.experimental.pallas import tpu as pltpu

LN_EPS = 1e-12       # BERT LayerNorm eps
NEG_INF = -10000.0   # HF BERT extended-attention-mask fill value


def _vmem_limit_bytes():
    """Generation-aware scoped-VMEM limit (headroom below physical ceiling)."""
    try:
        cap = int(pltpu.get_tpu_info().vmem_capacity_bytes)
    except Exception:
        cap = 64 * 1024 * 1024          # conservative (v7x physical per TC)
    return min(cap * 7 // 8, 112 * 1024 * 1024)


_VMEM_LIMIT = _vmem_limit_bytes()


# ----------------------------------------------------------------------------
# In-kernel helpers (traced inside Pallas kernels)
# ----------------------------------------------------------------------------
def _layernorm(x, gamma, beta):
    mu = jnp.mean(x, axis=-1, keepdims=True)
    var = jnp.mean((x - mu) ** 2, axis=-1, keepdims=True)
    return (x - mu) * lax.rsqrt(var + LN_EPS) * gamma + beta


def _gelu(x):
    # TODO(synk): HF BERT uses exact erf-based GELU; tanh approximation kept for
    # robust Pallas/TPU lowering (max abs diff ~1e-3 at these magnitudes).
    c = 0.7978845608028654  # sqrt(2/pi)
    return 0.5 * x * (1.0 + jnp.tanh(c * (x + 0.044715 * x * x * x)))


# ----------------------------------------------------------------------------
# Pallas kernels
# ----------------------------------------------------------------------------
def embed_ln_kernel(we_ref, pe_ref, te_ref, g_ref, b_ref, out_ref):
    # Fused embedding sum + LayerNorm for one batch row (avoids materializing
    # emb_sum in HBM).  we:(S,H) pe:(S,H) te:(1,H)
    x = we_ref[...] + pe_ref[...] + te_ref[...]
    out_ref[...] = _layernorm(x, g_ref[...], b_ref[...])


def bert_layer_kernel(num_heads, with_rationale,
                      h_ref, mask_ref,
                      wqkv_ref, bqkv_ref, wo_ref, bo_ref, g1_ref, b1_ref,
                      wi_ref, bi_ref, wo2_ref, bo2_ref, g2_ref, b2_ref,
                      *rest):
    """One BERT encoder layer for one batch row: MHA + Add&LN + FFN(GELU) + Add&LN.

    When `with_rationale`, the rationale head (H->1 row reduction + sigmoid) is
    fused in so the final hidden states are not re-read from HBM.
    """
    if with_rationale:
        (wr_ref, br_ref, out_ref, rat_ref,
         q_hm, k_hm, v_hm, ctx_hm, ctx_full) = rest
    else:
        (out_ref, q_hm, k_hm, v_hm, ctx_hm, ctx_full) = rest

    S, H = h_ref.shape
    hd = H // num_heads
    inv_sqrt_d = 1.0 / float(hd) ** 0.5

    h = h_ref[...]                               # (S, H) f32 — residual/LN math in f32
    hb = h.astype(jnp.bfloat16)                  # bf16 MXU operand

    # ---- fused QKV projection: ONE (S, 3H) MXU matmul (full output width) ----
    qkv = (jnp.dot(hb, wqkv_ref[...], preferred_element_type=jnp.float32)
           + bqkv_ref[...]).astype(jnp.bfloat16)                      # (S, 3H)

    # Scatter once into head-major scratches (static column slices), so the head
    # loop indexes heads dynamically without per-iteration lane relayout.
    for n in range(num_heads):                   # static, layout-only
        lo = n * hd
        q_hm[n] = qkv[:, lo:lo + hd]
        k_hm[n] = qkv[:, H + lo:H + lo + hd]
        v_hm[n] = qkv[:, 2 * H + lo:2 * H + lo + hd]

    mask_row = mask_ref[...]                     # (1, S): free sublane broadcast in the add

    # ---- per-head attention: fori_loop bounds each head's (S,S) live range ----
    # TODO(synk): at real sequence lengths, tile over keys with an online
    # (flash-style) softmax so the (S, S) score block never exceeds VMEM.
    def head_body(n, c):
        s = lax.dot_general(q_hm[n], k_hm[n], (((1,), (1,)), ((), ())),
                            preferred_element_type=jnp.float32) * inv_sqrt_d
        s = s + mask_row
        s = s - jnp.max(s, axis=-1, keepdims=True)
        p = jnp.exp(s)                                                # EUP
        p = p * pl.reciprocal(jnp.sum(p, axis=-1, keepdims=True), approx=True)
        ctx_hm[n] = jnp.dot(p.astype(jnp.bfloat16), v_hm[n],
                            preferred_element_type=jnp.float32).astype(jnp.bfloat16)
        return c
    lax.fori_loop(0, num_heads, head_body, 0)

    # Assemble the lane-aligned (S, H) context once (static column stores), then
    # ONE full-K output projection with the original (H, H) Wo weight.
    for n in range(num_heads):                   # static, layout-only
        ctx_full[:, n * hd:(n + 1) * hd] = ctx_hm[n]
    attn = jnp.dot(ctx_full[...], wo_ref[...],
                   preferred_element_type=jnp.float32) + bo_ref[...]  # (S, H)

    h1 = _layernorm(h + attn, g1_ref[...], b1_ref[...])
    ffn = _gelu(jnp.dot(h1.astype(jnp.bfloat16), wi_ref[...],
                        preferred_element_type=jnp.float32) + bi_ref[...])   # (S, I)
    ffn_out = jnp.dot(ffn.astype(jnp.bfloat16), wo2_ref[...],
                      preferred_element_type=jnp.float32) + bo2_ref[...]     # (S, H)
    out = _layernorm(h1 + ffn_out, g2_ref[...], b2_ref[...])
    out_ref[...] = out

    if with_rationale:
        # Rationale head fused on data already in VMEM: VPU row-reduction + exact sigmoid.
        r = jnp.sum(out * wr_ref[...], axis=-1, keepdims=True) + br_ref[...]  # (S, 1)
        rat_ref[...] = 1.0 / (1.0 + jnp.exp(-r))


def heads_kernel(cls_ref, wp_ref, bp_ref, wc_ref, bc_ref, logits_ref):
    """Pooler(tanh) + classifier on the CLS rows only (tiny, fits VMEM whole)."""
    pooled = jnp.tanh(
        jnp.dot(cls_ref[...].astype(jnp.bfloat16), wp_ref[...],
                preferred_element_type=jnp.float32) + bp_ref[...])
    logits_ref[...] = (
        jnp.dot(pooled.astype(jnp.bfloat16), wc_ref[...],
                preferred_element_type=jnp.float32) + bc_ref[...])


# ----------------------------------------------------------------------------
# pallas_call wrappers
# ----------------------------------------------------------------------------
def _resident(shape):
    """Whole-array block whose block index never changes -> weight stays in VMEM.

    Single-buffered (pl.Buffered(1)): the block is never re-fetched, so default
    double-buffering would only waste VMEM (critical headroom on v7x).
    """
    n = len(shape)
    idx = lambda b, _n=n: (0,) * _n
    try:
        return pl.BlockSpec(shape, idx, pipeline_mode=pl.Buffered(1))
    except Exception:
        # Older JAX without pipeline_mode / Buffered(1): fall back to default buffering.
        return pl.BlockSpec(shape, idx)


def embed_ln_call(we, pe, te, gamma, beta):
    B, S, H = we.shape
    return pl.pallas_call(
        embed_ln_kernel,
        out_shape=jax.ShapeDtypeStruct((B, S, H), jnp.float32),
        grid=(B,),
        in_specs=[pl.BlockSpec((None, S, H), lambda b: (b, 0, 0)),
                  _resident((S, H)), _resident((1, H)),
                  _resident((1, H)), _resident((1, H))],
        out_specs=pl.BlockSpec((None, S, H), lambda b: (b, 0, 0)),
        compiler_params=pltpu.CompilerParams(
            dimension_semantics=("parallel",),
            vmem_limit_bytes=_VMEM_LIMIT),
    )(we, pe, te, gamma, beta)


def bert_layer_call(lp, h, mask3, num_heads, rationale=None):
    B, S, H = h.shape
    I = lp['wi'].shape[1]
    hd = H // num_heads
    with_rationale = rationale is not None

    in_specs = [
        pl.BlockSpec((None, S, H), lambda b: (b, 0, 0)),    # activation row b
        pl.BlockSpec((None, 1, S), lambda b: (b, 0, 0)),    # additive mask row b
        _resident((H, 3 * H)), _resident((1, 3 * H)),       # fused wqkv, bqkv
        _resident((H, H)), _resident((1, H)),               # wo, bo
        _resident((1, H)), _resident((1, H)),               # ln1 gamma, beta
        _resident((H, I)), _resident((1, I)),               # wi, bi
        _resident((I, H)), _resident((1, H)),               # wo2, bo2
        _resident((1, H)), _resident((1, H)),               # ln2 gamma, beta
    ]
    args = [h, mask3,
            lp['wqkv'], lp['bqkv'], lp['wo'], lp['bo'], lp['ln1_g'], lp['ln1_b'],
            lp['wi'], lp['bi'], lp['wo2'], lp['bo2'], lp['ln2_g'], lp['ln2_b']]

    if with_rationale:
        wr, br = rationale
        in_specs += [_resident((1, H)), _resident((1, 1))]
        args += [wr, br]
        out_shape = (jax.ShapeDtypeStruct((B, S, H), jnp.float32),
                     jax.ShapeDtypeStruct((B, S, 1), jnp.float32))
        out_specs = (pl.BlockSpec((None, S, H), lambda b: (b, 0, 0)),
                     pl.BlockSpec((None, S, 1), lambda b: (b, 0, 0)))
    else:
        out_shape = jax.ShapeDtypeStruct((B, S, H), jnp.float32)
        out_specs = pl.BlockSpec((None, S, H), lambda b: (b, 0, 0))

    scratch_shapes = [
        pltpu.VMEM((num_heads, S, hd), jnp.bfloat16),   # q head-major
        pltpu.VMEM((num_heads, S, hd), jnp.bfloat16),   # k head-major
        pltpu.VMEM((num_heads, S, hd), jnp.bfloat16),   # v head-major
        pltpu.VMEM((num_heads, S, hd), jnp.bfloat16),   # ctx head-major
        pltpu.VMEM((S, H), jnp.bfloat16),               # assembled context
    ]

    # TODO(synk): at real BERT sizes (v7x 64 MiB VMEM) add a parallel S-tile grid
    # axis with flash-style key tiling, stream wi/wo2 with pltpu.emit_pipeline,
    # cross-call-prefetch the next layer's weights (v5e), and keep inter-layer
    # activations in bf16.
    return pl.pallas_call(
        functools.partial(bert_layer_kernel, num_heads, with_rationale),
        out_shape=out_shape,
        grid=(B,),
        in_specs=in_specs,
        out_specs=out_specs,
        scratch_shapes=scratch_shapes,
        compiler_params=pltpu.CompilerParams(
            dimension_semantics=("parallel",),
            vmem_limit_bytes=_VMEM_LIMIT),
    )(*args)


def heads_call(params, cls):
    B, H = cls.shape
    C = params['wc'].shape[1]
    vmem = pl.BlockSpec(memory_space=pltpu.MemorySpace.VMEM)
    return pl.pallas_call(
        heads_kernel,
        out_shape=jax.ShapeDtypeStruct((B, C), jnp.float32),
        in_specs=[vmem] * 5,
        out_specs=vmem,
        compiler_params=pltpu.CompilerParams(vmem_limit_bytes=_VMEM_LIMIT),
    )(cls, params['wp'], params['bp'], params['wc'], params['bc'])


# ----------------------------------------------------------------------------
# Parameter init (deterministic, synthetic — no pretrained checkpoint)
# ----------------------------------------------------------------------------
def init_params(key, vocab, hidden, n_layers, intermediate, max_pos, n_classes):
    bf16 = jnp.bfloat16

    def nrm(k, shape, dtype=jnp.float32, scale=0.02):
        return (scale * jax.random.normal(k, shape, dtype=jnp.float32)).astype(dtype)

    keys = jax.random.split(key, 8 + n_layers)
    params = {
        'word_emb': nrm(keys[0], (vocab, hidden)),
        'pos_emb':  nrm(keys[1], (max_pos, hidden)),
        'type_emb': nrm(keys[2], (2, hidden)),
        'emb_ln_g': jnp.ones((1, hidden), jnp.float32),
        'emb_ln_b': jnp.zeros((1, hidden), jnp.float32),
        'wp': nrm(keys[3], (hidden, hidden), bf16),     # pooler dense (bf16 MXU operand)
        'bp': jnp.zeros((1, hidden), jnp.float32),
        'wc': nrm(keys[4], (hidden, n_classes), bf16),  # classifier
        'bc': jnp.zeros((1, n_classes), jnp.float32),
        'wr': nrm(keys[5], (1, hidden)),                # rationale decoder row (f32, VPU path)
        'br': jnp.zeros((1, 1), jnp.float32),
        'layers': [],
    }
    # TODO(synk): weights are quantized to bf16 at init (forward-only benchmark);
    # a training path would keep f32 masters and cast on load.
    for l in range(n_layers):
        lk = jax.random.split(keys[8 + l], 6)
        wqkv = jnp.concatenate(
            [nrm(lk[0], (hidden, hidden), bf16),
             nrm(lk[1], (hidden, hidden), bf16),
             nrm(lk[2], (hidden, hidden), bf16)], axis=1)            # (H, 3H) fused
        params['layers'].append({
            'wqkv': wqkv,
            'bqkv': jnp.zeros((1, 3 * hidden), jnp.float32),
            'wo': nrm(lk[3], (hidden, hidden), bf16),
            'bo': jnp.zeros((1, hidden), jnp.float32),
            'ln1_g': jnp.ones((1, hidden), jnp.float32),
            'ln1_b': jnp.zeros((1, hidden), jnp.float32),
            'wi':  nrm(lk[4], (hidden, intermediate), bf16),
            'bi':  jnp.zeros((1, intermediate), jnp.float32),
            'wo2': nrm(lk[5], (intermediate, hidden), bf16),
            'bo2': jnp.zeros((1, hidden), jnp.float32),
            'ln2_g': jnp.ones((1, hidden), jnp.float32),
            'ln2_b': jnp.zeros((1, hidden), jnp.float32),
        })
    return params


# ----------------------------------------------------------------------------
# BERT2BERT forward
# ----------------------------------------------------------------------------
def bert2bert_forward(params, input_ids, attention_mask, num_heads,
                      labels=None, rationale_labels=None, rationale_weight=0.5):
    B, S = input_ids.shape

    # --- embeddings: gather is plain-JAX glue; sum + LayerNorm is a fused kernel ---
    # TODO(synk): the vocab gather could move in-kernel via pl.Element row gather.
    we = jnp.take(params['word_emb'], input_ids, axis=0)          # (B, S, H)
    pe = params['pos_emb'][:S]                                    # (S, H)
    te = params['type_emb'][0:1]                                  # (1, H) token_type_ids = 0
    h = embed_ln_call(we, pe, te, params['emb_ln_g'], params['emb_ln_b'])

    # additive mask, like HF's get_extended_attention_mask
    add_mask3 = ((1.0 - attention_mask.astype(jnp.float32)) * NEG_INF)[:, None, :]  # (B,1,S)

    # --- encoder layers (fused, batch-parallel Pallas kernel per layer);
    #     rationale head fused into the last layer (no re-read of h) ---
    n_layers = len(params['layers'])
    rat3 = None
    for li, lp in enumerate(params['layers']):
        if li == n_layers - 1:
            h, rat3 = bert_layer_call(lp, h, add_mask3, num_heads,
                                      rationale=(params['wr'], params['br']))
        else:
            h = bert_layer_call(lp, h, add_mask3, num_heads)
    rationale_probs = rat3[..., 0]                                 # (B, S)

    # --- pooler + classifier on CLS rows only ---
    cls = h[:, 0, :]                                               # (B, H) glue slice
    class_logits = heads_call(params, cls)

    # --- losses (tiny scalar reductions; plain-JAX glue) ---
    loss = None
    if labels is not None and rationale_labels is not None:
        logp = jax.nn.log_softmax(class_logits, axis=-1)
        classification_loss = -jnp.mean(
            jnp.take_along_axis(logp, labels[:, None], axis=-1))
        p = jnp.clip(rationale_probs, 1e-7, 1.0 - 1e-7)
        rationale_loss = -jnp.mean(
            rationale_labels * jnp.log(p) + (1.0 - rationale_labels) * jnp.log(1.0 - p))
        loss = classification_loss + rationale_weight * rationale_loss

    return class_logits, rationale_probs, loss


# ----------------------------------------------------------------------------
# Main
# ----------------------------------------------------------------------------
if __name__ == "__main__":
    # small synthetic BERT config
    VOCAB, HIDDEN, N_HEADS, N_LAYERS = 100, 32, 4, 2
    INTERMEDIATE, MAX_POS, N_CLASSES = 64, 16, 3
    B, S = 2, 8

    key = jax.random.PRNGKey(0)
    kp, k1, k2, k3 = jax.random.split(key, 4)

    params = init_params(kp, VOCAB, HIDDEN, N_LAYERS, INTERMEDIATE,
                         MAX_POS, N_CLASSES)

    input_ids = jax.random.randint(k1, (B, S), 0, VOCAB, dtype=jnp.int32)
    attention_mask = jnp.array([[1] * S, [1] * (S - 2) + [0] * 2], dtype=jnp.int32)
    labels = jax.random.randint(k2, (B,), 0, N_CLASSES, dtype=jnp.int32)
    rationale_labels = (jax.random.uniform(k3, (B, S)) > 0.5).astype(jnp.float32)

    fwd = jax.jit(functools.partial(bert2bert_forward, num_heads=N_HEADS,
                                    rationale_weight=0.5))
    class_logits, rationale_probs, loss = fwd(
        params, input_ids, attention_mask,
        labels=labels, rationale_labels=rationale_labels)

    jax.block_until_ready((class_logits, rationale_probs, loss))
    assert class_logits.shape == (B, N_CLASSES)
    assert rationale_probs.shape == (B, S)
    assert loss.shape == ()
    assert bool(jnp.all(jnp.isfinite(class_logits)))
    assert bool(jnp.all((rationale_probs >= 0.0) & (rationale_probs <= 1.0)))
    print("KERNEL_OK")
</pallas_src>

<mosaic_0001>
module attributes {stable_mosaic.version = 11 : i64} {
  func.func @embed_ln_kernel(%arg0: i32, %arg1: memref<1x8x32xf32, #tpu.memory_space<vmem>>, %arg2: memref<8x32xf32, #tpu.memory_space<vmem>>, %arg3: memref<1x32xf32, #tpu.memory_space<vmem>>, %arg4: memref<1x32xf32, #tpu.memory_space<vmem>>, %arg5: memref<1x32xf32, #tpu.memory_space<vmem>>, %arg6: memref<1x8x32xf32, #tpu.memory_space<vmem>>) attributes {dimension_semantics = [#tpu.dimension_semantics<parallel>], iteration_bounds = array<i64: 2>, scalar_prefetch = 0 : i64, scratch_operands = 0 : i64, tpu.core_type = #tpu.core_type<tc>, window_params = [{transform_indices = @transform_0, window_bounds = array<i64: 1, 8, 32>}, {pipeline_mode = #tpu.pipeline_mode<synchronous>, transform_indices = @transform_1, window_bounds = array<i64: 8, 32>}, {pipeline_mode = #tpu.pipeline_mode<synchronous>, transform_indices = @transform_2, window_bounds = array<i64: 1, 32>}, {pipeline_mode = #tpu.pipeline_mode<synchronous>, transform_indices = @transform_3, window_bounds = array<i64: 1, 32>}, {pipeline_mode = #tpu.pipeline_mode<synchronous>, transform_indices = @transform_4, window_bounds = array<i64: 1, 32>}, {transform_indices = @transform_5, window_bounds = array<i64: 1, 8, 32>}]} {
    %c0 = arith.constant 0 : index
    %c0_0 = arith.constant 0 : index
    %c0_1 = arith.constant 0 : index
    %0 = vector.load %arg1[%c0, %c0_0, %c0_1] : memref<1x8x32xf32, #tpu.memory_space<vmem>>, vector<1x8x32xf32>
    %1 = vector.shape_cast %0 : vector<1x8x32xf32> to vector<8x32xf32>
    %c0_2 = arith.constant 0 : index
    %c0_3 = arith.constant 0 : index
    %2 = vector.load %arg2[%c0_2, %c0_3] : memref<8x32xf32, #tpu.memory_space<vmem>>, vector<8x32xf32>
    %3 = arith.addf %1, %2 : vector<8x32xf32>
    %c0_4 = arith.constant 0 : index
    %c0_5 = arith.constant 0 : index
    %4 = vector.load %arg3[%c0_4, %c0_5] : memref<1x32xf32, #tpu.memory_space<vmem>>, vector<1x32xf32>
    %5 = vector.broadcast %4 : vector<1x32xf32> to vector<8x32xf32>
    %6 = arith.addf %3, %5 : vector<8x32xf32>
    %c0_6 = arith.constant 0 : index
    %c0_7 = arith.constant 0 : index
    %7 = vector.load %arg4[%c0_6, %c0_7] : memref<1x32xf32, #tpu.memory_space<vmem>>, vector<1x32xf32>
    %c0_8 = arith.constant 0 : index
    %c0_9 = arith.constant 0 : index
    %8 = vector.load %arg5[%c0_8, %c0_9] : memref<1x32xf32, #tpu.memory_space<vmem>>, vector<1x32xf32>
    %cst = arith.constant dense<0.000000e+00> : vector<8xf32>
    %9 = vector.multi_reduction <add>, %6, %cst [1] : vector<8x32xf32> to vector<8xf32>
    %10 = vector.shape_cast %9 : vector<8xf32> to vector<8x1xf32>
    %cst_10 = arith.constant 3.200000e+01 : f32
    %11 = vector.broadcast %cst_10 : f32 to vector<8x1xf32>
    %12 = arith.divf %10, %11 : vector<8x1xf32>
    %13 = vector.broadcast %12 : vector<8x1xf32> to vector<8x32xf32>
    %14 = arith.subf %6, %13 : vector<8x32xf32>
    %15 = arith.mulf %14, %14 : vector<8x32xf32>
    %cst_11 = arith.constant dense<0.000000e+00> : vector<8xf32>
    %16 = vector.multi_reduction <add>, %15, %cst_11 [1] : vector<8x32xf32> to vector<8xf32>
    %17 = vector.shape_cast %16 : vector<8xf32> to vector<8x1xf32>
    %cst_12 = arith.constant 3.200000e+01 : f32
    %18 = vector.broadcast %cst_12 : f32 to vector<8x1xf32>
    %19 = arith.divf %17, %18 : vector<8x1xf32>
    %20 = vector.broadcast %12 : vector<8x1xf32> to vector<8x32xf32>
    %21 = arith.subf %6, %20 : vector<8x32xf32>
    %cst_13 = arith.constant 9.99999996E-13 : f32
    %22 = vector.broadcast %cst_13 : f32 to vector<8x1xf32>
    %23 = arith.addf %19, %22 : vector<8x1xf32>
    %24 = math.rsqrt %23 : vector<8x1xf32>
    %25 = vector.broadcast %24 : vector<8x1xf32> to vector<8x32xf32>
    %26 = arith.mulf %21, %25 : vector<8x32xf32>
    %27 = vector.broadcast %7 : vector<1x32xf32> to vector<8x32xf32>
    %28 = arith.mulf %26, %27 : vector<8x32xf32>
    %29 = vector.broadcast %8 : vector<1x32xf32> to vector<8x32xf32>
    %30 = arith.addf %28, %29 : vector<8x32xf32>
    %c0_14 = arith.constant 0 : index
    %c0_15 = arith.constant 0 : index
    %c0_16 = arith.constant 0 : index
    %31 = vector.load %arg6[%c0_14, %c0_15, %c0_16] : memref<1x8x32xf32, #tpu.memory_space<vmem>>, vector<1x8x32xf32>
    %32 = vector.shape_cast %31 : vector<1x8x32xf32> to vector<8x32xf32>
    %33 = vector.shape_cast %30 : vector<8x32xf32> to vector<1x8x32xf32>
    tpu.vector_store %arg6[%c0_14, %c0_15, %c0_16], %33 {strides = array<i32>} : memref<1x8x32xf32, #tpu.memory_space<vmem>>, vector<1x8x32xf32>,
    return
  }
  func.func @transform_0(%arg0: i32) -> (i32, i32, i32) {
    %c0_i32 = arith.constant 0 : i32
    %c0_i32_0 = arith.constant 0 : i32
    %c0_i32_1 = arith.constant 0 : i32
    return %arg0, %c0_i32, %c0_i32_0 : i32, i32, i32
  }
  func.func @transform_1(%arg0: i32) -> (i32, i32) {
    %c0_i32 = arith.constant 0 : i32
    %c0_i32_0 = arith.constant 0 : i32
    %c0_i32_1 = arith.constant 0 : i32
    return %c0_i32, %c0_i32_0 : i32, i32
  }
  func.func @transform_2(%arg0: i32) -> (i32, i32) {
    %c0_i32 = arith.constant 0 : i32
    %c0_i32_0 = arith.constant 0 : i32
    %c0_i32_1 = arith.constant 0 : i32
    return %c0_i32, %c0_i32_0 : i32, i32
  }
  func.func @transform_3(%arg0: i32) -> (i32, i32) {
    %c0_i32 = arith.constant 0 : i32
    %c0_i32_0 = arith.constant 0 : i32
    %c0_i32_1 = arith.constant 0 : i32
    return %c0_i32, %c0_i32_0 : i32, i32
  }
  func.func @transform_4(%arg0: i32) -> (i32, i32) {
    %c0_i32 = arith.constant 0 : i32
    %c0_i32_0 = arith.constant 0 : i32
    %c0_i32_1 = arith.constant 0 : i32
    return %c0_i32, %c0_i32_0 : i32, i32
  }
  func.func @transform_5(%arg0: i32) -> (i32, i32, i32) {
    %c0_i32 = arith.constant 0 : i32
    %c0_i32_0 = arith.constant 0 : i32
    %c0_i32_1 = arith.constant 0 : i32
    return %arg0, %c0_i32, %c0_i32_0 : i32, i32, i32
  }
}

module attributes {stable_mosaic.version = 11 : i64} {
  func.func @bert_layer_kernel(%arg0: i32, %arg1: memref<1x8x32xf32, #tpu.memory_space<vmem>>, %arg2: memref<1x1x8xf32, #tpu.memory_space<vmem>>, %arg3: memref<32x96xbf16, #tpu.memory_space<vmem>>, %arg4: memref<1x96xf32, #tpu.memory_space<vmem>>, %arg5: memref<32x32xbf16, #tpu.memory_space<vmem>>, %arg6: memref<1x32xf32, #tpu.memory_space<vmem>>, %arg7: memref<1x32xf32, #tpu.memory_space<vmem>>, %arg8: memref<1x32xf32, #tpu.memory_space<vmem>>, %arg9: memref<32x64xbf16, #tpu.memory_space<vmem>>, %arg10: memref<1x64xf32, #tpu.memory_space<vmem>>, %arg11: memref<64x32xbf16, #tpu.memory_space<vmem>>, %arg12: memref<1x32xf32, #tpu.memory_space<vmem>>, %arg13: memref<1x32xf32, #tpu.memory_space<vmem>>, %arg14: memref<1x32xf32, #tpu.memory_space<vmem>>, %arg15: memref<1x8x32xf32, #tpu.memory_space<vmem>>, %arg16: memref<4x8x8xbf16, #tpu.memory_space<vmem>>, %arg17: memref<4x8x8xbf16, #tpu.memory_space<vmem>>, %arg18: memref<4x8x8xbf16, #tpu.memory_space<vmem>>, %arg19: memref<4x8x8xbf16, #tpu.memory_space<vmem>>, %arg20: memref<8x32xbf16, #tpu.memory_space<vmem>>) attributes {dimension_semantics = [#tpu.dimension_semantics<parallel>], iteration_bounds = array<i64: 2>, scalar_prefetch = 0 : i64, scratch_operands = 5 : i64, tpu.core_type = #tpu.core_type<tc>, window_params = [{transform_indices = @transform_0, window_bounds = array<i64: 1, 8, 32>}, {transform_indices = @transform_1, window_bounds = array<i64: 1, 1, 8>}, {pipeline_mode = #tpu.pipeline_mode<synchronous>, transform_indices = @transform_2, window_bounds = array<i64: 32, 96>}, {pipeline_mode = #tpu.pipeline_mode<synchronous>, transform_indices = @transform_3, window_bounds = array<i64: 1, 96>}, {pipeline_mode = #tpu.pipeline_mode<synchronous>, transform_indices = @transform_4, window_bounds = array<i64: 32, 32>}, {pipeline_mode = #tpu.pipeline_mode<synchronous>, transform_indices = @transform_5, window_bounds = array<i64: 1, 32>}, {pipeline_mode = #tpu.pipeline_mode<synchronous>, transform_indices = @transform_6, window_bounds = array<i64: 1, 32>}, {pipeline_mode = #tpu.pipeline_mode<synchronous>, transform_indices = @transform_7, window_bounds = array<i64: 1, 32>}, {pipeline_mode = #tpu.pipeline_mode<synchronous>, transform_indices = @transform_8, window_bounds = array<i64: 32, 64>}, {pipeline_mode = #tpu.pipeline_mode<synchronous>, transform_indices = @transform_9, window_bounds = array<i64: 1, 64>}, {pipeline_mode = #tpu.pipeline_mode<synchronous>, transform_indices = @transform_10, window_bounds = array<i64: 64, 32>}, {pipeline_mode = #tpu.pipeline_mode<synchronous>, transform_indices = @transform_11, window_bounds = array<i64: 1, 32>}, {pipeline_mode = #tpu.pipeline_mode<synchronous>, transform_indices = @transform_12, window_bounds = array<i64: 1, 32>}, {pipeline_mode = #tpu.pipeline_mode<synchronous>, transform_indices = @transform_13, window_bounds = array<i64: 1, 32>}, {transform_indices = @transform_14, window_bounds = array<i64: 1, 8, 32>}]} {
    %c0 = arith.constant 0 : index
    %c0_0 = arith.constant 0 : index
    %c0_1 = arith.constant 0 : index
    %0 = vector.load %arg1[%c0, %c0_0, %c0_1] : memref<1x8x32xf32, #tpu.memory_space<vmem>>, vector<1x8x32xf32>
    %1 = vector.shape_cast %0 : vector<1x8x32xf32> to vector<8x32xf32>
    %2 = arith.truncf %1 : vector<8x32xf32> to vector<8x32xbf16>
    %c0_2 = arith.constant 0 : index
    %c0_3 = arith.constant 0 : index
    %3 = vector.load %arg3[%c0_2, %c0_3] : memref<32x96xbf16, #tpu.memory_space<vmem>>, vector<32x96xbf16>
    %cst = arith.constant dense<0.000000e+00> : vector<8x96xf32>
    %4 = tpu.matmul %2, %3, %cst {dimension_numbers = #tpu.dot_dimension_numbers<[1], [0], [0], [1], [0, 0, 1, 1], [], []>} : vector<8x32xbf16>, vector<32x96xbf16>, vector<8x96xf32> -> vector<8x96xf32>
    %c0_4 = arith.constant 0 : index
    %c0_5 = arith.constant 0 : index
    %5 = vector.load %arg4[%c0_4, %c0_5] : memref<1x96xf32, #tpu.memory_space<vmem>>, vector<1x96xf32>
    %6 = vector.broadcast %5 : vector<1x96xf32> to vector<8x96xf32>
    %7 = arith.addf %4, %6 : vector<8x96xf32>
    %8 = arith.truncf %7 : vector<8x96xf32> to vector<8x96xbf16>
    %9 = vector.extract_strided_slice %8 {offsets = [0, 0], sizes = [8, 8], strides = [1, 1]} : vector<8x96xbf16> to vector<8x8xbf16>
    %c0_6 = arith.constant 0 : index
    %c0_7 = arith.constant 0 : index
    %c0_8 = arith.constant 0 : index
    %10 = vector.load %arg16[%c0_6, %c0_7, %c0_8] : memref<4x8x8xbf16, #tpu.memory_space<vmem>>, vector<1x8x8xbf16>
    %11 = vector.shape_cast %10 : vector<1x8x8xbf16> to vector<8x8xbf16>
    %12 = vector.shape_cast %9 : vector<8x8xbf16> to vector<1x8x8xbf16>
    tpu.vector_store %arg16[%c0_6, %c0_7, %c0_8], %12 {strides = array<i32>} : memref<4x8x8xbf16, #tpu.memory_space<vmem>>, vector<1x8x8xbf16>,
    %13 = vector.extract_strided_slice %8 {offsets = [0, 32], sizes = [8, 8], strides = [1, 1]} : vector<8x96xbf16> to vector<8x8xbf16>
    %c0_9 = arith.constant 0 : index
    %c0_10 = arith.constant 0 : index
    %c0_11 = arith.constant 0 : index
    %14 = vector.load %arg17[%c0_9, %c0_10, %c0_11] : memref<4x8x8xbf16, #tpu.memory_space<vmem>>, vector<1x8x8xbf16>
    %15 = vector.shape_cast %14 : vector<1x8x8xbf16> to vector<8x8xbf16>
    %16 = vector.shape_cast %13 : vector<8x8xbf16> to vector<1x8x8xbf16>
    tpu.vector_store %arg17[%c0_9, %c0_10, %c0_11], %16 {strides = array<i32>} : memref<4x8x8xbf16, #tpu.memory_space<vmem>>, vector<1x8x8xbf16>,
    %17 = vector.extract_strided_slice %8 {offsets = [0, 64], sizes = [8, 8], strides = [1, 1]} : vector<8x96xbf16> to vector<8x8xbf16>
    %c0_12 = arith.constant 0 : index
    %c0_13 = arith.constant 0 : index
    %c0_14 = arith.constant 0 : index
    %18 = vector.load %arg18[%c0_12, %c0_13, %c0_14] : memref<4x8x8xbf16, #tpu.memory_space<vmem>>, vector<1x8x8xbf16>
    %19 = vector.shape_cast %18 : vector<1x8x8xbf16> to vector<8x8xbf16>
    %20 = vector.shape_cast %17 : vector<8x8xbf16> to vector<1x8x8xbf16>
    tpu.vector_store %arg18[%c0_12, %c0_13, %c0_14], %20 {strides = array<i32>} : memref<4x8x8xbf16, #tpu.memory_space<vmem>>, vector<1x8x8xbf16>,
    %21 = vector.extract_strided_slice %8 {offsets = [0, 8], sizes = [8, 8], strides = [1, 1]} : vector<8x96xbf16> to vector<8x8xbf16>
    %c1 = arith.constant 1 : index
    %c0_15 = arith.constant 0 : index
    %c0_16 = arith.constant 0 : index
    %22 = vector.load %arg16[%c1, %c0_15, %c0_16] : memref<4x8x8xbf16, #tpu.memory_space<vmem>>, vector<1x8x8xbf16>
    %23 = vector.shape_cast %22 : vector<1x8x8xbf16> to vector<8x8xbf16>
    %24 = vector.shape_cast %21 : vector<8x8xbf16> to vector<1x8x8xbf16>
    tpu.vector_store %arg16[%c1, %c0_15, %c0_16], %24 {strides = array<i32>} : memref<4x8x8xbf16, #tpu.memory_space<vmem>>, vector<1x8x8xbf16>,
    %25 = vector.extract_strided_slice %8 {offsets = [0, 40], sizes = [8, 8], strides = [1, 1]} : vector<8x96xbf16> to vector<8x8xbf16>
    %c1_17 = arith.constant 1 : index
    %c0_18 = arith.constant 0 : index
    %c0_19 = arith.constant 0 : index
    %26 = vector.load %arg17[%c1_17, %c0_18, %c0_19] : memref<4x8x8xbf16, #tpu.memory_space<vmem>>, vector<1x8x8xbf16>
    %27 = vector.shape_cast %26 : vector<1x8x8xbf16> to vector<8x8xbf16>
    %28 = vector.shape_cast %25 : vector<8x8xbf16> to vector<1x8x8xbf16>
    tpu.vector_store %arg17[%c1_17, %c0_18, %c0_19], %28 {strides = array<i32>} : memref<4x8x8xbf16, #tpu.memory_space<vmem>>, vector<1x8x8xbf16>,
    %29 = vector.extract_strided_slice %8 {offsets = [0, 72], sizes = [8, 8], strides = [1, 1]} : vector<8x96xbf16> to vector<8x8xbf16>
    %c1_20 = arith.constant 1 : index
    %c0_21 = arith.constant 0 : index
    %c0_22 = arith.constant 0 : index
    %30 = vector.load %arg18[%c1_20, %c0_21, %c0_22] : memref<4x8x8xbf16, #tpu.memory_space<vmem>>, vector<1x8x8xbf16>
    %31 = vector.shape_cast %30 : vector<1x8x8xbf16> to vector<8x8xbf16>
    %32 = vector.shape_cast %29 : vector<8x8xbf16> to vector<1x8x8xbf16>
    tpu.vector_store %arg18[%c1_20, %c0_21, %c0_22], %32 {strides = array<i32>} : memref<4x8x8xbf16, #tpu.memory_space<vmem>>, vector<1x8x8xbf16>,
    %33 = vector.extract_strided_slice %8 {offsets = [0, 16], sizes = [8, 8], strides = [1, 1]} : vector<8x96xbf16> to vector<8x8xbf16>
    %c2 = arith.constant 2 : index
    %c0_23 = arith.constant 0 : index
    %c0_24 = arith.constant 0 : index
    %34 = vector.load %arg16[%c2, %c0_23, %c0_24] : memref<4x8x8xbf16, #tpu.memory_space<vmem>>, vector<1x8x8xbf16>
    %35 = vector.shape_cast %34 : vector<1x8x8xbf16> to vector<8x8xbf16>
    %36 = vector.shape_cast %33 : vector<8x8xbf16> to vector<1x8x8xbf16>
    tpu.vector_store %arg16[%c2, %c0_23, %c0_24], %36 {strides = array<i32>} : memref<4x8x8xbf16, #tpu.memory_space<vmem>>, vector<1x8x8xbf16>,
    %37 = vector.extract_strided_slice %8 {offsets = [0, 48], sizes = [8, 8], strides = [1, 1]} : vector<8x96xbf16> to vector<8x8xbf16>
    %c2_25 = arith.constant 2 : index
    %c0_26 = arith.constant 0 : index
    %c0_27 = arith.constant 0 : index
    %38 = vector.load %arg17[%c2_25, %c0_26, %c0_27] : memref<4x8x8xbf16, #tpu.memory_space<vmem>>, vector<1x8x8xbf16>
    %39 = vector.shape_cast %38 : vector<1x8x8xbf16> to vector<8x8xbf16>
    %40 = vector.shape_cast %37 : vector<8x8xbf16> to vector<1x8x8xbf16>
    tpu.vector_store %arg17[%c2_25, %c0_26, %c0_27], %40 {strides = array<i32>} : memref<4x8x8xbf16, #tpu.memory_space<vmem>>, vector<1x8x8xbf16>,
    %41 = vector.extract_strided_slice %8 {offsets = [0, 80], sizes = [8, 8], strides = [1, 1]} : vector<8x96xbf16> to vector<8x8xbf16>
    %c2_28 = arith.constant 2 : index
    %c0_29 = arith.constant 0 : index
    %c0_30 = arith.constant 0 : index
    %42 = vector.load %arg18[%c2_28, %c0_29, %c0_30] : memref<4x8x8xbf16, #tpu.memory_space<vmem>>, vector<1x8x8xbf16>
    %43 = vector.shape_cast %42 : vector<1x8x8xbf16> to vector<8x8xbf16>
    %44 = vector.shape_cast %41 : vector<8x8xbf16> to vector<1x8x8xbf16>
    tpu.vector_store %arg18[%c2_28, %c0_29, %c0_30], %44 {strides = array<i32>} : memref<4x8x8xbf16, #tpu.memory_space<vmem>>, vector<1x8x8xbf16>,
    %45 = vector.extract_strided_slice %8 {offsets = [0, 24], sizes = [8, 8], strides = [1, 1]} : vector<8x96xbf16> to vector<8x8xbf16>
    %c3 = arith.constant 3 : index
    %c0_31 = arith.constant 0 : index
    %c0_32 = arith.constant 0 : index
    %46 = vector.load %arg16[%c3, %c0_31, %c0_32] : memref<4x8x8xbf16, #tpu.memory_space<vmem>>, vector<1x8x8xbf16>
    %47 = vector.shape_cast %46 : vector<1x8x8xbf16> to vector<8x8xbf16>
    %48 = vector.shape_cast %45 : vector<8x8xbf16> to vector<1x8x8xbf16>
    tpu.vector_store %arg16[%c3, %c0_31, %c0_32], %48 {strides = array<i32>} : memref<4x8x8xbf16, #tpu.memory_space<vmem>>, vector<1x8x8xbf16>,
    %49 = vector.extract_strided_slice %8 {offsets = [0, 56], sizes = [8, 8], strides = [1, 1]} : vector<8x96xbf16> to vector<8x8xbf16>
    %c3_33 = arith.constant 3 : index
    %c0_34 = arith.constant 0 : index
    %c0_35 = arith.constant 0 : index
    %50 = vector.load %arg17[%c3_33, %c0_34, %c0_35] : memref<4x8x8xbf16, #tpu.memory_space<vmem>>, vector<1x8x8xbf16>
    %51 = vector.shape_cast %50 : vector<1x8x8xbf16> to vector<8x8xbf16>
    %52 = vector.shape_cast %49 : vector<8x8xbf16> to vector<1x8x8xbf16>
    tpu.vector_store %arg17[%c3_33, %c0_34, %c0_35], %52 {strides = array<i32>} : memref<4x8x8xbf16, #tpu.memory_space<vmem>>, vector<1x8x8xbf16>,
    %53 = vector.extract_strided_slice %8 {offsets = [0, 88], sizes = [8, 8], strides = [1, 1]} : vector<8x96xbf16> to vector<8x8xbf16>
    %c3_36 = arith.constant 3 : index
    %c0_37 = arith.constant 0 : index
    %c0_38 = arith.constant 0 : index
    %54 = vector.load %arg18[%c3_36, %c0_37, %c0_38] : memref<4x8x8xbf16, #tpu.memory_space<vmem>>, vector<1x8x8xbf16>
    %55 = vector.shape_cast %54 : vector<1x8x8xbf16> to vector<8x8xbf16>
    %56 = vector.shape_cast %53 : vector<8x8xbf16> to vector<1x8x8xbf16>
    tpu.vector_store %arg18[%c3_36, %c0_37, %c0_38], %56 {strides = array<i32>} : memref<4x8x8xbf16, #tpu.memory_space<vmem>>, vector<1x8x8xbf16>,
    %c0_39 = arith.constant 0 : index
    %c0_40 = arith.constant 0 : index
    %c0_41 = arith.constant 0 : index
    %57 = vector.load %arg2[%c0_39, %c0_40, %c0_41] : memref<1x1x8xf32, #tpu.memory_space<vmem>>, vector<1x1x8xf32>
    %58 = vector.shape_cast %57 : vector<1x1x8xf32> to vector<1x8xf32>
    %c0_i32 = arith.constant 0 : i32
    %c4_i32 = arith.constant 4 : i32
    %59 = arith.addi %c0_i32, %c4_i32 : i32
    %c1_i32 = arith.constant 1 : i32
    scf.for %arg21 = %c0_i32 to %59 step %c1_i32  : i32 {
      %156 = arith.index_cast %arg21 : i32 to index
      %c0_102 = arith.constant 0 : index
      %c0_103 = arith.constant 0 : index
      %157 = vector.load %arg16[%156, %c0_102, %c0_103] : memref<4x8x8xbf16, #tpu.memory_space<vmem>>, vector<1x8x8xbf16>
      %158 = vector.shape_cast %157 : vector<1x8x8xbf16> to vector<8x8xbf16>
      %159 = arith.index_cast %arg21 : i32 to index
      %c0_104 = arith.constant 0 : index
      %c0_105 = arith.constant 0 : index
      %160 = vector.load %arg17[%159, %c0_104, %c0_105] : memref<4x8x8xbf16, #tpu.memory_space<vmem>>, vector<1x8x8xbf16>
      %161 = vector.shape_cast %160 : vector<1x8x8xbf16> to vector<8x8xbf16>
      %cst_106 = arith.constant dense<0.000000e+00> : vector<8x8xf32>
      %162 = tpu.matmul %158, %161, %cst_106 {dimension_numbers = #tpu.dot_dimension_numbers<[1], [1], [0], [0], [0, 0, 1, 0], [], []>} : vector<8x8xbf16>, vector<8x8xbf16>, vector<8x8xf32> -> vector<8x8xf32>
      %cst_107 = arith.constant 0.353553385 : f32
      %163 = vector.broadcast %cst_107 : f32 to vector<8x8xf32>
      %164 = arith.mulf %162, %163 : vector<8x8xf32>
      %165 = vector.broadcast %58 : vector<1x8xf32> to vector<8x8xf32>
      %166 = arith.addf %164, %165 : vector<8x8xf32>
      %cst_108 = arith.constant dense<0xFF800000> : vector<8xf32>
      %167 = vector.multi_reduction <maximumf>, %166, %cst_108 [1] : vector<8x8xf32> to vector<8xf32>
      %168 = vector.shape_cast %167 : vector<8xf32> to vector<8x1xf32>
      %169 = vector.broadcast %168 : vector<8x1xf32> to vector<8x8xf32>
      %170 = arith.subf %166, %169 : vector<8x8xf32>
      %171 = math.exp %170 : vector<8x8xf32>
      %cst_109 = arith.constant dense<0.000000e+00> : vector<8xf32>
      %172 = vector.multi_reduction <add>, %171, %cst_109 [1] : vector<8x8xf32> to vector<8xf32>
      %173 = vector.shape_cast %172 : vector<8xf32> to vector<8x1xf32>
      %174 = tpu.reciprocal %173 {approx = true} : vector<8x1xf32> -> vector<8x1xf32>
      %175 = vector.broadcast %174 : vector<8x1xf32> to vector<8x8xf32>
      %176 = arith.mulf %171, %175 : vector<8x8xf32>
      %177 = arith.truncf %176 : vector<8x8xf32> to vector<8x8xbf16>
      %178 = arith.index_cast %arg21 : i32 to index
      %c0_110 = arith.constant 0 : index
      %c0_111 = arith.constant 0 : index
      %179 = vector.load %arg18[%178, %c0_110, %c0_111] : memref<4x8x8xbf16, #tpu.memory_space<vmem>>, vector<1x8x8xbf16>
      %180 = vector.shape_cast %179 : vector<1x8x8xbf16> to vector<8x8xbf16>
      %cst_112 = arith.constant dense<0.000000e+00> : vector<8x8xf32>
      %181 = tpu.matmul %177, %180, %cst_112 {dimension_numbers = #tpu.dot_dimension_numbers<[1], [0], [0], [1], [0, 0, 1, 1], [], []>} : vector<8x8xbf16>, vector<8x8xbf16>, vector<8x8xf32> -> vector<8x8xf32>
      %182 = arith.truncf %181 : vector<8x8xf32> to vector<8x8xbf16>
      %183 = arith.index_cast %arg21 : i32 to index
      %c0_113 = arith.constant 0 : index
      %c0_114 = arith.constant 0 : index
      %184 = vector.load %arg19[%183, %c0_113, %c0_114] : memref<4x8x8xbf16, #tpu.memory_space<vmem>>, vector<1x8x8xbf16>
      %185 = vector.shape_cast %184 : vector<1x8x8xbf16> to vector<8x8xbf16>
      %186 = vector.shape_cast %182 : vector<8x8xbf16> to vector<1x8x8xbf16>
      tpu.vector_store %arg19[%183, %c0_113, %c0_114], %186 {strides = array<i32>} : memref<4x8x8xbf16, #tpu.memory_space<vmem>>, vector<1x8x8xbf16>,
    }
    %c4_i32_42 = arith.constant 4 : i32
    %c0_43 = arith.constant 0 : index
    %c0_44 = arith.constant 0 : index
    %c0_45 = arith.constant 0 : index
    %60 = vector.load %arg19[%c0_43, %c0_44, %c0_45] : memref<4x8x8xbf16, #tpu.memory_space<vmem>>, vector<1x8x8xbf16>
    %61 = vector.shape_cast %60 : vector<1x8x8xbf16> to vector<8x8xbf16>
    %c0_46 = arith.constant 0 : index
    %c0_47 = arith.constant 0 : index
    %62 = vector.load %arg20[%c0_46, %c0_47] : memref<8x32xbf16, #tpu.memory_space<vmem>>, vector<8x8xbf16>
    tpu.vector_store %arg20[%c0_46, %c0_47], %61 {strides = array<i32>} : memref<8x32xbf16, #tpu.memory_space<vmem>>, vector<8x8xbf16>,
    %c1_48 = arith.constant 1 : index
    %c0_49 = arith.constant 0 : index
    %c0_50 = arith.constant 0 : index
    %63 = vector.load %arg19[%c1_48, %c0_49, %c0_50] : memref<4x8x8xbf16, #tpu.memory_space<vmem>>, vector<1x8x8xbf16>
    %64 = vector.shape_cast %63 : vector<1x8x8xbf16> to vector<8x8xbf16>
    %c0_51 = arith.constant 0 : index
    %c8 = arith.constant 8 : index
    %65 = vector.load %arg20[%c0_51, %c8] : memref<8x32xbf16, #tpu.memory_space<vmem>>, vector<8x8xbf16>
    tpu.vector_store %arg20[%c0_51, %c8], %64 {strides = array<i32>} : memref<8x32xbf16, #tpu.memory_space<vmem>>, vector<8x8xbf16>,
    %c2_52 = arith.constant 2 : index
    %c0_53 = arith.constant 0 : index
    %c0_54 = arith.constant 0 : index
    %66 = vector.load %arg19[%c2_52, %c0_53, %c0_54] : memref<4x8x8xbf16, #tpu.memory_space<vmem>>, vector<1x8x8xbf16>
    %67 = vector.shape_cast %66 : vector<1x8x8xbf16> to vector<8x8xbf16>
    %c0_55 = arith.constant 0 : index
    %c16 = arith.constant 16 : index
    %68 = vector.load %arg20[%c0_55, %c16] : memref<8x32xbf16, #tpu.memory_space<vmem>>, vector<8x8xbf16>
    tpu.vector_store %arg20[%c0_55, %c16], %67 {strides = array<i32>} : memref<8x32xbf16, #tpu.memory_space<vmem>>, vector<8x8xbf16>,
    %c3_56 = arith.constant 3 : index
    %c0_57 = arith.constant 0 : index
    %c0_58 = arith.constant 0 : index
    %69 = vector.load %arg19[%c3_56, %c0_57, %c0_58] : memref<4x8x8xbf16, #tpu.memory_space<vmem>>, vector<1x8x8xbf16>
    %70 = vector.shape_cast %69 : vector<1x8x8xbf16> to vector<8x8xbf16>
    %c0_59 = arith.constant 0 : index
    %c24 = arith.constant 24 : index
    %71 = vector.load %arg20[%c0_59, %c24] : memref<8x32xbf16, #tpu.memory_space<vmem>>, vector<8x8xbf16>
    tpu.vector_store %arg20[%c0_59, %c24], %70 {strides = array<i32>} : memref<8x32xbf16, #tpu.memory_space<vmem>>, vector<8x8xbf16>,
    %c0_60 = arith.constant 0 : index
    %c0_61 = arith.constant 0 : index
    %72 = vector.load %arg20[%c0_60, %c0_61] : memref<8x32xbf16, #tpu.memory_space<vmem>>, vector<8x32xbf16>
    %c0_62 = arith.constant 0 : index
    %c0_63 = arith.constant 0 : index
    %73 = vector.load %arg5[%c0_62, %c0_63] : memref<32x32xbf16, #tpu.memory_space<vmem>>, vector<32x32xbf16>
    %cst_64 = arith.constant dense<0.000000e+00> : vector<8x32xf32>
    %74 = tpu.matmul %72, %73, %cst_64 {dimension_numbers = #tpu.dot_dimension_numbers<[1], [0], [0], [1], [0, 0, 1, 1], [], []>} : vector<8x32xbf16>, vector<32x32xbf16>, vector<8x32xf32> -> vector<8x32xf32>
    %c0_65 = arith.constant 0 : index
    %c0_66 = arith.constant 0 : index
    %75 = vector.load %arg6[%c0_65, %c0_66] : memref<1x32xf32, #tpu.memory_space<vmem>>, vector<1x32xf32>
    %76 = vector.broadcast %75 : vector<1x32xf32> to vector<8x32xf32>
    %77 = arith.addf %74, %76 : vector<8x32xf32>
    %78 = arith.addf %1, %77 : vector<8x32xf32>
    %c0_67 = arith.constant 0 : index
    %c0_68 = arith.constant 0 : index
    %79 = vector.load %arg7[%c0_67, %c0_68] : memref<1x32xf32, #tpu.memory_space<vmem>>, vector<1x32xf32>
    %c0_69 = arith.constant 0 : index
    %c0_70 = arith.constant 0 : index
    %80 = vector.load %arg8[%c0_69, %c0_70] : memref<1x32xf32, #tpu.memory_space<vmem>>, vector<1x32xf32>
    %cst_71 = arith.constant dense<0.000000e+00> : vector<8xf32>
    %81 = vector.multi_reduction <add>, %78, %cst_71 [1] : vector<8x32xf32> to vector<8xf32>
    %82 = vector.shape_cast %81 : vector<8xf32> to vector<8x1xf32>
    %cst_72 = arith.constant 3.200000e+01 : f32
    %83 = vector.broadcast %cst_72 : f32 to vector<8x1xf32>
    %84 = arith.divf %82, %83 : vector<8x1xf32>
    %85 = vector.broadcast %84 : vector<8x1xf32> to vector<8x32xf32>
    %86 = arith.subf %78, %85 : vector<8x32xf32>
    %87 = arith.mulf %86, %86 : vector<8x32xf32>
    %cst_73 = arith.constant dense<0.000000e+00> : vector<8xf32>
    %88 = vector.multi_reduction <add>, %87, %cst_73 [1] : vector<8x32xf32> to vector<8xf32>
    %89 = vector.shape_cast %88 : vector<8xf32> to vector<8x1xf32>
    %cst_74 = arith.constant 3.200000e+01 : f32
    %90 = vector.broadcast %cst_74 : f32 to vector<8x1xf32>
    %91 = arith.divf %89, %90 : vector<8x1xf32>
    %92 = vector.broadcast %84 : vector<8x1xf32> to vector<8x32xf32>
    %93 = arith.subf %78, %92 : vector<8x32xf32>
    %cst_75 = arith.constant 9.99999996E-13 : f32
    %94 = vector.broadcast %cst_75 : f32 to vector<8x1xf32>
    %95 = arith.addf %91, %94 : vector<8x1xf32>
    %96 = math.rsqrt %95 : vector<8x1xf32>
    %97 = vector.broadcast %96 : vector<8x1xf32> to vector<8x32xf32>
    %98 = arith.mulf %93, %97 : vector<8x32xf32>
    %99 = vector.broadcast %79 : vector<1x32xf32> to vector<8x32xf32>
    %100 = arith.mulf %98, %99 : vector<8x32xf32>
    %101 = vector.broadcast %80 : vector<1x32xf32> to vector<8x32xf32>
    %102 = arith.addf %100, %101 : vector<8x32xf32>
    %103 = arith.truncf %102 : vector<8x32xf32> to vector<8x32xbf16>
    %c0_76 = arith.constant 0 : index
    %c0_77 = arith.constant 0 : index
    %104 = vector.load %arg9[%c0_76, %c0_77] : memref<32x64xbf16, #tpu.memory_space<vmem>>, vector<32x64xbf16>
    %cst_78 = arith.constant dense<0.000000e+00> : vector<8x64xf32>
    %105 = tpu.matmul %103, %104, %cst_78 {dimension_numbers = #tpu.dot_dimension_numbers<[1], [0], [0], [1], [0, 0, 1, 1], [], []>} : vector<8x32xbf16>, vector<32x64xbf16>, vector<8x64xf32> -> vector<8x64xf32>
    %c0_79 = arith.constant 0 : index
    %c0_80 = arith.constant 0 : index
    %106 = vector.load %arg10[%c0_79, %c0_80] : memref<1x64xf32, #tpu.memory_space<vmem>>, vector<1x64xf32>
    %107 = vector.broadcast %106 : vector<1x64xf32> to vector<8x64xf32>
    %108 = arith.addf %105, %107 : vector<8x64xf32>
    %cst_81 = arith.constant 5.000000e-01 : f32
    %109 = vector.broadcast %cst_81 : f32 to vector<8x64xf32>
    %110 = arith.mulf %109, %108 : vector<8x64xf32>
    %cst_82 = arith.constant 4.471500e-02 : f32
    %111 = vector.broadcast %cst_82 : f32 to vector<8x64xf32>
    %112 = arith.mulf %111, %108 : vector<8x64xf32>
    %113 = arith.mulf %112, %108 : vector<8x64xf32>
    %114 = arith.mulf %113, %108 : vector<8x64xf32>
    %115 = arith.addf %108, %114 : vector<8x64xf32>
    %cst_83 = arith.constant 0.797884583 : f32
    %116 = vector.broadcast %cst_83 : f32 to vector<8x64xf32>
    %117 = arith.mulf %116, %115 : vector<8x64xf32>
    %118 = math.tanh %117 : vector<8x64xf32>
    %cst_84 = arith.constant 1.000000e+00 : f32
    %119 = vector.broadcast %cst_84 : f32 to vector<8x64xf32>
    %120 = arith.addf %119, %118 : vector<8x64xf32>
    %121 = arith.mulf %110, %120 : vector<8x64xf32>
    %122 = arith.truncf %121 : vector<8x64xf32> to vector<8x64xbf16>
    %c0_85 = arith.constant 0 : index
    %c0_86 = arith.constant 0 : index
    %123 = vector.load %arg11[%c0_85, %c0_86] : memref<64x32xbf16, #tpu.memory_space<vmem>>, vector<64x32xbf16>
    %cst_87 = arith.constant dense<0.000000e+00> : vector<8x32xf32>
    %124 = tpu.matmul %122, %123, %cst_87 {dimension_numbers = #tpu.dot_dimension_numbers<[1], [0], [0], [1], [0, 0, 1, 1], [], []>} : vector<8x64xbf16>, vector<64x32xbf16>, vector<8x32xf32> -> vector<8x32xf32>
    %c0_88 = arith.constant 0 : index
    %c0_89 = arith.constant 0 : index
    %125 = vector.load %arg12[%c0_88, %c0_89] : memref<1x32xf32, #tpu.memory_space<vmem>>, vector<1x32xf32>
    %126 = vector.broadcast %125 : vector<1x32xf32> to vector<8x32xf32>
    %127 = arith.addf %124, %126 : vector<8x32xf32>
    %128 = arith.addf %102, %127 : vector<8x32xf32>
    %c0_90 = arith.constant 0 : index
    %c0_91 = arith.constant 0 : index
    %129 = vector.load %arg13[%c0_90, %c0_91] : memref<1x32xf32, #tpu.memory_space<vmem>>, vector<1x32xf32>
    %c0_92 = arith.constant 0 : index
    %c0_93 = arith.constant 0 : index
    %130 = vector.load %arg14[%c0_92, %c0_93] : memref<1x32xf32, #tpu.memory_space<vmem>>, vector<1x32xf32>
    %cst_94 = arith.constant dense<0.000000e+00> : vector<8xf32>
    %131 = vector.multi_reduction <add>, %128, %cst_94 [1] : vector<8x32xf32> to vector<8xf32>
    %132 = vector.shape_cast %131 : vector<8xf32> to vector<8x1xf32>
    %cst_95 = arith.constant 3.200000e+01 : f32
    %133 = vector.broadcast %cst_95 : f32 to vector<8x1xf32>
    %134 = arith.divf %132, %133 : vector<8x1xf32>
    %135 = vector.broadcast %134 : vector<8x1xf32> to vector<8x32xf32>
    %136 = arith.subf %128, %135 : vector<8x32xf32>
    %137 = arith.mulf %136, %136 : vector<8x32xf32>
    %cst_96 = arith.constant dense<0.000000e+00> : vector<8xf32>
    %138 = vector.multi_reduction <add>, %137, %cst_96 [1] : vector<8x32xf32> to vector<8xf32>
    %139 = vector.shape_cast %138 : vector<8xf32> to vector<8x1xf32>
    %cst_97 = arith.constant 3.200000e+01 : f32
    %140 = vector.broadcast %cst_97 : f32 to vector<8x1xf32>
    %141 = arith.divf %139, %140 : vector<8x1xf32>
    %142 = vector.broadcast %134 : vector<8x1xf32> to vector<8x32xf32>
    %143 = arith.subf %128, %142 : vector<8x32xf32>
    %cst_98 = arith.constant 9.99999996E-13 : f32
    %144 = vector.broadcast %cst_98 : f32 to vector<8x1xf32>
    %145 = arith.addf %141, %144 : vector<8x1xf32>
    %146 = math.rsqrt %145 : vector<8x1xf32>
    %147 = vector.broadcast %146 : vector<8x1xf32> to vector<8x32xf32>
    %148 = arith.mulf %143, %147 : vector<8x32xf32>
    %149 = vector.broadcast %129 : vector<1x32xf32> to vector<8x32xf32>
    %150 = arith.mulf %148, %149 : vector<8x32xf32>
    %151 = vector.broadcast %130 : vector<1x32xf32> to vector<8x32xf32>
    %152 = arith.addf %150, %151 : vector<8x32xf32>
    %c0_99 = arith.constant 0 : index
    %c0_100 = arith.constant 0 : index
    %c0_101 = arith.constant 0 : index
    %153 = vector.load %arg15[%c0_99, %c0_100, %c0_101] : memref<1x8x32xf32, #tpu.memory_space<vmem>>, vector<1x8x32xf32>
    %154 = vector.shape_cast %153 : vector<1x8x32xf32> to vector<8x32xf32>
    %155 = vector.shape_cast %152 : vector<8x32xf32> to vector<1x8x32xf32>
    tpu.vector_store %arg15[%c0_99, %c0_100, %c0_101], %155 {strides = array<i32>} : memref<1x8x32xf32, #tpu.memory_space<vmem>>, vector<1x8x32xf32>,
    return
  }
  func.func @transform_0(%arg0: i32) -> (i32, i32, i32) {
    %c0_i32 = arith.constant 0 : i32
    %c0_i32_0 = arith.constant 0 : i32
    %c0_i32_1 = arith.constant 0 : i32
    return %arg0, %c0_i32, %c0_i32_0 : i32, i32, i32
  }
  func.func @transform_1(%arg0: i32) -> (i32, i32, i32) {
    %c0_i32 = arith.constant 0 : i32
    %c0_i32_0 = arith.constant 0 : i32
    %c0_i32_1 = arith.constant 0 : i32
    return %arg0, %c0_i32, %c0_i32_0 : i32, i32, i32
  }
  func.func @transform_2(%arg0: i32) -> (i32, i32) {
    %c0_i32 = arith.constant 0 : i32
    %c0_i32_0 = arith.constant 0 : i32
    %c0_i32_1 = arith.constant 0 : i32
    return %c0_i32, %c0_i32_0 : i32, i32
  }
  func.func @transform_3(%arg0: i32) -> (i32, i32) {
    %c0_i32 = arith.constant 0 : i32
    %c0_i32_0 = arith.constant 0 : i32
    %c0_i32_1 = arith.constant 0 : i32
    return %c0_i32, %c0_i32_0 : i32, i32
  }
  func.func @transform_4(%arg0: i32) -> (i32, i32) {
    %c0_i32 = arith.constant 0 : i32
    %c0_i32_0 = arith.constant 0 : i32
    %c0_i32_1 = arith.constant 0 : i32
    return %c0_i32, %c0_i32_0 : i32, i32
  }
  func.func @transform_5(%arg0: i32) -> (i32, i32) {
    %c0_i32 = arith.constant 0 : i32
    %c0_i32_0 = arith.constant 0 : i32
    %c0_i32_1 = arith.constant 0 : i32
    return %c0_i32, %c0_i32_0 : i32, i32
  }
  func.func @transform_6(%arg0: i32) -> (i32, i32) {
    %c0_i32 = arith.constant 0 : i32
    %c0_i32_0 = arith.constant 0 : i32
    %c0_i32_1 = arith.constant 0 : i32
    return %c0_i32, %c0_i32_0 : i32, i32
  }
  func.func @transform_7(%arg0: i32) -> (i32, i32) {
    %c0_i32 = arith.constant 0 : i32
    %c0_i32_0 = arith.constant 0 : i32
    %c0_i32_1 = arith.constant 0 : i32
    return %c0_i32, %c0_i32_0 : i32, i32
  }
  func.func @transform_8(%arg0: i32) -> (i32, i32) {
    %c0_i32 = arith.constant 0 : i32
    %c0_i32_0 = arith.constant 0 : i32
    %c0_i32_1 = arith.constant 0 : i32
    return %c0_i32, %c0_i32_0 : i32, i32
  }
  func.func @transform_9(%arg0: i32) -> (i32, i32) {
    %c0_i32 = arith.constant 0 : i32
    %c0_i32_0 = arith.constant 0 : i32
    %c0_i32_1 = arith.constant 0 : i32
    return %c0_i32, %c0_i32_0 : i32, i32
  }
  func.func @transform_10(%arg0: i32) -> (i32, i32) {
    %c0_i32 = arith.constant 0 : i32
    %c0_i32_0 = arith.constant 0 : i32
    %c0_i32_1 = arith.constant 0 : i32
    return %c0_i32, %c0_i32_0 : i32, i32
  }
  func.func @transform_11(%arg0: i32) -> (i32, i32) {
    %c0_i32 = arith.constant 0 : i32
    %c0_i32_0 = arith.constant 0 : i32
    %c0_i32_1 = arith.constant 0 : i32
    return %c0_i32, %c0_i32_0 : i32, i32
  }
  func.func @transform_12(%arg0: i32) -> (i32, i32) {
    %c0_i32 = arith.constant 0 : i32
    %c0_i32_0 = arith.constant 0 : i32
    %c0_i32_1 = arith.constant 0 : i32
    return %c0_i32, %c0_i32_0 : i32, i32
  }
  func.func @transform_13(%arg0: i32) -> (i32, i32) {
    %c0_i32 = arith.constant 0 : i32
    %c0_i32_0 = arith.constant 0 : i32
    %c0_i32_1 = arith.constant 0 : i32
    return %c0_i32, %c0_i32_0 : i32, i32
  }
  func.func @transform_14(%arg0: i32) -> (i32, i32, i32) {
    %c0_i32 = arith.constant 0 : i32
    %c0_i32_0 = arith.constant 0 : i32
    %c0_i32_1 = arith.constant 0 : i32
    return %arg0, %c0_i32, %c0_i32_0 : i32, i32, i32
  }
}

module attributes {stable_mosaic.version = 11 : i64} {
  func.func @bert_layer_kernel(%arg0: i32, %arg1: memref<1x8x32xf32, #tpu.memory_space<vmem>>, %arg2: memref<1x1x8xf32, #tpu.memory_space<vmem>>, %arg3: memref<32x96xbf16, #tpu.memory_space<vmem>>, %arg4: memref<1x96xf32, #tpu.memory_space<vmem>>, %arg5: memref<32x32xbf16, #tpu.memory_space<vmem>>, %arg6: memref<1x32xf32, #tpu.memory_space<vmem>>, %arg7: memref<1x32xf32, #tpu.memory_space<vmem>>, %arg8: memref<1x32xf32, #tpu.memory_space<vmem>>, %arg9: memref<32x64xbf16, #tpu.memory_space<vmem>>, %arg10: memref<1x64xf32, #tpu.memory_space<vmem>>, %arg11: memref<64x32xbf16, #tpu.memory_space<vmem>>, %arg12: memref<1x32xf32, #tpu.memory_space<vmem>>, %arg13: memref<1x32xf32, #tpu.memory_space<vmem>>, %arg14: memref<1x32xf32, #tpu.memory_space<vmem>>, %arg15: memref<1x32xf32, #tpu.memory_space<vmem>>, %arg16: memref<1x1xf32, #tpu.memory_space<vmem>>, %arg17: memref<1x8x32xf32, #tpu.memory_space<vmem>>, %arg18: memref<1x8x1xf32, #tpu.memory_space<vmem>>, %arg19: memref<4x8x8xbf16, #tpu.memory_space<vmem>>, %arg20: memref<4x8x8xbf16, #tpu.memory_space<vmem>>, %arg21: memref<4x8x8xbf16, #tpu.memory_space<vmem>>, %arg22: memref<4x8x8xbf16, #tpu.memory_space<vmem>>, %arg23: memref<8x32xbf16, #tpu.memory_space<vmem>>) attributes {dimension_semantics = [#tpu.dimension_semantics<parallel>], iteration_bounds = array<i64: 2>, scalar_prefetch = 0 : i64, scratch_operands = 5 : i64, tpu.core_type = #tpu.core_type<tc>, window_params = [{transform_indices = @transform_0, window_bounds = array<i64: 1, 8, 32>}, {transform_indices = @transform_1, window_bounds = array<i64: 1, 1, 8>}, {pipeline_mode = #tpu.pipeline_mode<synchronous>, transform_indices = @transform_2, window_bounds = array<i64: 32, 96>}, {pipeline_mode = #tpu.pipeline_mode<synchronous>, transform_indices = @transform_3, window_bounds = array<i64: 1, 96>}, {pipeline_mode = #tpu.pipeline_mode<synchronous>, transform_indices = @transform_4, window_bounds = array<i64: 32, 32>}, {pipeline_mode = #tpu.pipeline_mode<synchronous>, transform_indices = @transform_5, window_bounds = array<i64: 1, 32>}, {pipeline_mode = #tpu.pipeline_mode<synchronous>, transform_indices = @transform_6, window_bounds = array<i64: 1, 32>}, {pipeline_mode = #tpu.pipeline_mode<synchronous>, transform_indices = @transform_7, window_bounds = array<i64: 1, 32>}, {pipeline_mode = #tpu.pipeline_mode<synchronous>, transform_indices = @transform_8, window_bounds = array<i64: 32, 64>}, {pipeline_mode = #tpu.pipeline_mode<synchronous>, transform_indices = @transform_9, window_bounds = array<i64: 1, 64>}, {pipeline_mode = #tpu.pipeline_mode<synchronous>, transform_indices = @transform_10, window_bounds = array<i64: 64, 32>}, {pipeline_mode = #tpu.pipeline_mode<synchronous>, transform_indices = @transform_11, window_bounds = array<i64: 1, 32>}, {pipeline_mode = #tpu.pipeline_mode<synchronous>, transform_indices = @transform_12, window_bounds = array<i64: 1, 32>}, {pipeline_mode = #tpu.pipeline_mode<synchronous>, transform_indices = @transform_13, window_bounds = array<i64: 1, 32>}, {pipeline_mode = #tpu.pipeline_mode<synchronous>, transform_indices = @transform_14, window_bounds = array<i64: 1, 32>}, {pipeline_mode = #tpu.pipeline_mode<synchronous>, transform_indices = @transform_15, window_bounds = array<i64: 1, 1>}, {transform_indices = @transform_16, window_bounds = array<i64: 1, 8, 32>}, {transform_indices = @transform_17, window_bounds = array<i64: 1, 8, 1>}]} {
    %c0 = arith.constant 0 : index
    %c0_0 = arith.constant 0 : index
    %c0_1 = arith.constant 0 : index
    %0 = vector.load %arg1[%c0, %c0_0, %c0_1] : memref<1x8x32xf32, #tpu.memory_space<vmem>>, vector<1x8x32xf32>
    %1 = vector.shape_cast %0 : vector<1x8x32xf32> to vector<8x32xf32>
    %2 = arith.truncf %1 : vector<8x32xf32> to vector<8x32xbf16>
    %c0_2 = arith.constant 0 : index
    %c0_3 = arith.constant 0 : index
    %3 = vector.load %arg3[%c0_2, %c0_3] : memref<32x96xbf16, #tpu.memory_space<vmem>>, vector<32x96xbf16>
    %cst = arith.constant dense<0.000000e+00> : vector<8x96xf32>
    %4 = tpu.matmul %2, %3, %cst {dimension_numbers = #tpu.dot_dimension_numbers<[1], [0], [0], [1], [0, 0, 1, 1], [], []>} : vector<8x32xbf16>, vector<32x96xbf16>, vector<8x96xf32> -> vector<8x96xf32>
    %c0_4 = arith.constant 0 : index
    %c0_5 = arith.constant 0 : index
    %5 = vector.load %arg4[%c0_4, %c0_5] : memref<1x96xf32, #tpu.memory_space<vmem>>, vector<1x96xf32>
    %6 = vector.broadcast %5 : vector<1x96xf32> to vector<8x96xf32>
    %7 = arith.addf %4, %6 : vector<8x96xf32>
    %8 = arith.truncf %7 : vector<8x96xf32> to vector<8x96xbf16>
    %9 = vector.extract_strided_slice %8 {offsets = [0, 0], sizes = [8, 8], strides = [1, 1]} : vector<8x96xbf16> to vector<8x8xbf16>
    %c0_6 = arith.constant 0 : index
    %c0_7 = arith.constant 0 : index
    %c0_8 = arith.constant 0 : index
    %10 = vector.load %arg19[%c0_6, %c0_7, %c0_8] : memref<4x8x8xbf16, #tpu.memory_space<vmem>>, vector<1x8x8xbf16>
    %11 = vector.shape_cast %10 : vector<1x8x8xbf16> to vector<8x8xbf16>
    %12 = vector.shape_cast %9 : vector<8x8xbf16> to vector<1x8x8xbf16>
    tpu.vector_store %arg19[%c0_6, %c0_7, %c0_8], %12 {strides = array<i32>} : memref<4x8x8xbf16, #tpu.memory_space<vmem>>, vector<1x8x8xbf16>,
    %13 = vector.extract_strided_slice %8 {offsets = [0, 32], sizes = [8, 8], strides = [1, 1]} : vector<8x96xbf16> to vector<8x8xbf16>
    %c0_9 = arith.constant 0 : index
    %c0_10 = arith.constant 0 : index
    %c0_11 = arith.constant 0 : index
    %14 = vector.load %arg20[%c0_9, %c0_10, %c0_11] : memref<4x8x8xbf16, #tpu.memory_space<vmem>>, vector<1x8x8xbf16>
    %15 = vector.shape_cast %14 : vector<1x8x8xbf16> to vector<8x8xbf16>
    %16 = vector.shape_cast %13 : vector<8x8xbf16> to vector<1x8x8xbf16>
    tpu.vector_store %arg20[%c0_9, %c0_10, %c0_11], %16 {strides = array<i32>} : memref<4x8x8xbf16, #tpu.memory_space<vmem>>, vector<1x8x8xbf16>,
    %17 = vector.extract_strided_slice %8 {offsets = [0, 64], sizes = [8, 8], strides = [1, 1]} : vector<8x96xbf16> to vector<8x8xbf16>
    %c0_12 = arith.constant 0 : index
    %c0_13 = arith.constant 0 : index
    %c0_14 = arith.constant 0 : index
    %18 = vector.load %arg21[%c0_12, %c0_13, %c0_14] : memref<4x8x8xbf16, #tpu.memory_space<vmem>>, vector<1x8x8xbf16>
    %19 = vector.shape_cast %18 : vector<1x8x8xbf16> to vector<8x8xbf16>
    %20 = vector.shape_cast %17 : vector<8x8xbf16> to vector<1x8x8xbf16>
    tpu.vector_store %arg21[%c0_12, %c0_13, %c0_14], %20 {strides = array<i32>} : memref<4x8x8xbf16, #tpu.memory_space<vmem>>, vector<1x8x8xbf16>,
    %21 = vector.extract_strided_slice %8 {offsets = [0, 8], sizes = [8, 8], strides = [1, 1]} : vector<8x96xbf16> to vector<8x8xbf16>
    %c1 = arith.constant 1 : index
    %c0_15 = arith.constant 0 : index
    %c0_16 = arith.constant 0 : index
    %22 = vector.load %arg19[%c1, %c0_15, %c0_16] : memref<4x8x8xbf16, #tpu.memory_space<vmem>>, vector<1x8x8xbf16>
    %23 = vector.shape_cast %22 : vector<1x8x8xbf16> to vector<8x8xbf16>
    %24 = vector.shape_cast %21 : vector<8x8xbf16> to vector<1x8x8xbf16>
    tpu.vector_store %arg19[%c1, %c0_15, %c0_16], %24 {strides = array<i32>} : memref<4x8x8xbf16, #tpu.memory_space<vmem>>, vector<1x8x8xbf16>,
    %25 = vector.extract_strided_slice %8 {offsets = [0, 40], sizes = [8, 8], strides = [1, 1]} : vector<8x96xbf16> to vector<8x8xbf16>
    %c1_17 = arith.constant 1 : index
    %c0_18 = arith.constant 0 : index
    %c0_19 = arith.constant 0 : index
    %26 = vector.load %arg20[%c1_17, %c0_18, %c0_19] : memref<4x8x8xbf16, #tpu.memory_space<vmem>>, vector<1x8x8xbf16>
    %27 = vector.shape_cast %26 : vector<1x8x8xbf16> to vector<8x8xbf16>
    %28 = vector.shape_cast %25 : vector<8x8xbf16> to vector<1x8x8xbf16>
    tpu.vector_store %arg20[%c1_17, %c0_18, %c0_19], %28 {strides = array<i32>} : memref<4x8x8xbf16, #tpu.memory_space<vmem>>, vector<1x8x8xbf16>,
    %29 = vector.extract_strided_slice %8 {offsets = [0, 72], sizes = [8, 8], strides = [1, 1]} : vector<8x96xbf16> to vector<8x8xbf16>
    %c1_20 = arith.constant 1 : index
    %c0_21 = arith.constant 0 : index
    %c0_22 = arith.constant 0 : index
    %30 = vector.load %arg21[%c1_20, %c0_21, %c0_22] : memref<4x8x8xbf16, #tpu.memory_space<vmem>>, vector<1x8x8xbf16>
    %31 = vector.shape_cast %30 : vector<1x8x8xbf16> to vector<8x8xbf16>
    %32 = vector.shape_cast %29 : vector<8x8xbf16> to vector<1x8x8xbf16>
    tpu.vector_store %arg21[%c1_20, %c0_21, %c0_22], %32 {strides = array<i32>} : memref<4x8x8xbf16, #tpu.memory_space<vmem>>, vector<1x8x8xbf16>,
    %33 = vector.extract_strided_slice %8 {offsets = [0, 16], sizes = [8, 8], strides = [1, 1]} : vector<8x96xbf16> to vector<8x8xbf16>
    %c2 = arith.constant 2 : index
    %c0_23 = arith.constant 0 : index
    %c0_24 = arith.constant 0 : index
    %34 = vector.load %arg19[%c2, %c0_23, %c0_24] : memref<4x8x8xbf16, #tpu.memory_space<vmem>>, vector<1x8x8xbf16>
    %35 = vector.shape_cast %34 : vector<1x8x8xbf16> to vector<8x8xbf16>
    %36 = vector.shape_cast %33 : vector<8x8xbf16> to vector<1x8x8xbf16>
    tpu.vector_store %arg19[%c2, %c0_23, %c0_24], %36 {strides = array<i32>} : memref<4x8x8xbf16, #tpu.memory_space<vmem>>, vector<1x8x8xbf16>,
    %37 = vector.extract_strided_slice %8 {offsets = [0, 48], sizes = [8, 8], strides = [1, 1]} : vector<8x96xbf16> to vector<8x8xbf16>
    %c2_25 = arith.constant 2 : index
    %c0_26 = arith.constant 0 : index
    %c0_27 = arith.constant 0 : index
    %38 = vector.load %arg20[%c2_25, %c0_26, %c0_27] : memref<4x8x8xbf16, #tpu.memory_space<vmem>>, vector<1x8x8xbf16>
    %39 = vector.shape_cast %38 : vector<1x8x8xbf16> to vector<8x8xbf16>
    %40 = vector.shape_cast %37 : vector<8x8xbf16> to vector<1x8x8xbf16>
    tpu.vector_store %arg20[%c2_25, %c0_26, %c0_27], %40 {strides = array<i32>} : memref<4x8x8xbf16, #tpu.memory_space<vmem>>, vector<1x8x8xbf16>,
    %41 = vector.extract_strided_slice %8 {offsets = [0, 80], sizes = [8, 8], strides = [1, 1]} : vector<8x96xbf16> to vector<8x8xbf16>
    %c2_28 = arith.constant 2 : index
    %c0_29 = arith.constant 0 : index
    %c0_30 = arith.constant 0 : index
    %42 = vector.load %arg21[%c2_28, %c0_29, %c0_30] : memref<4x8x8xbf16, #tpu.memory_space<vmem>>, vector<1x8x8xbf16>
    %43 = vector.shape_cast %42 : vector<1x8x8xbf16> to vector<8x8xbf16>
    %44 = vector.shape_cast %41 : vector<8x8xbf16> to vector<1x8x8xbf16>
    tpu.vector_store %arg21[%c2_28, %c0_29, %c0_30], %44 {strides = array<i32>} : memref<4x8x8xbf16, #tpu.memory_space<vmem>>, vector<1x8x8xbf16>,
    %45 = vector.extract_strided_slice %8 {offsets = [0, 24], sizes = [8, 8], strides = [1, 1]} : vector<8x96xbf16> to vector<8x8xbf16>
    %c3 = arith.constant 3 : index
    %c0_31 = arith.constant 0 : index
    %c0_32 = arith.constant 0 : index
    %46 = vector.load %arg19[%c3, %c0_31, %c0_32] : memref<4x8x8xbf16, #tpu.memory_space<vmem>>, vector<1x8x8xbf16>
    %47 = vector.shape_cast %46 : vector<1x8x8xbf16> to vector<8x8xbf16>
    %48 = vector.shape_cast %45 : vector<8x8xbf16> to vector<1x8x8xbf16>
    tpu.vector_store %arg19[%c3, %c0_31, %c0_32], %48 {strides = array<i32>} : memref<4x8x8xbf16, #tpu.memory_space<vmem>>, vector<1x8x8xbf16>,
    %49 = vector.extract_strided_slice %8 {offsets = [0, 56], sizes = [8, 8], strides = [1, 1]} : vector<8x96xbf16> to vector<8x8xbf16>
    %c3_33 = arith.constant 3 : index
    %c0_34 = arith.constant 0 : index
    %c0_35 = arith.constant 0 : index
    %50 = vector.load %arg20[%c3_33, %c0_34, %c0_35] : memref<4x8x8xbf16, #tpu.memory_space<vmem>>, vector<1x8x8xbf16>
    %51 = vector.shape_cast %50 : vector<1x8x8xbf16> to vector<8x8xbf16>
    %52 = vector.shape_cast %49 : vector<8x8xbf16> to vector<1x8x8xbf16>
    tpu.vector_store %arg20[%c3_33, %c0_34, %c0_35], %52 {strides = array<i32>} : memref<4x8x8xbf16, #tpu.memory_space<vmem>>, vector<1x8x8xbf16>,
    %53 = vector.extract_strided_slice %8 {offsets = [0, 88], sizes = [8, 8], strides = [1, 1]} : vector<8x96xbf16> to vector<8x8xbf16>
    %c3_36 = arith.constant 3 : index
    %c0_37 = arith.constant 0 : index
    %c0_38 = arith.constant 0 : index
    %54 = vector.load %arg21[%c3_36, %c0_37, %c0_38] : memref<4x8x8xbf16, #tpu.memory_space<vmem>>, vector<1x8x8xbf16>
    %55 = vector.shape_cast %54 : vector<1x8x8xbf16> to vector<8x8xbf16>
    %56 = vector.shape_cast %53 : vector<8x8xbf16> to vector<1x8x8xbf16>
    tpu.vector_store %arg21[%c3_36, %c0_37, %c0_38], %56 {strides = array<i32>} : memref<4x8x8xbf16, #tpu.memory_space<vmem>>, vector<1x8x8xbf16>,
    %c0_39 = arith.constant 0 : index
    %c0_40 = arith.constant 0 : index
    %c0_41 = arith.constant 0 : index
    %57 = vector.load %arg2[%c0_39, %c0_40, %c0_41] : memref<1x1x8xf32, #tpu.memory_space<vmem>>, vector<1x1x8xf32>
    %58 = vector.shape_cast %57 : vector<1x1x8xf32> to vector<1x8xf32>
    %c0_i32 = arith.constant 0 : i32
    %c4_i32 = arith.constant 4 : i32
    %59 = arith.addi %c0_i32, %c4_i32 : i32
    %c1_i32 = arith.constant 1 : i32
    scf.for %arg24 = %c0_i32 to %59 step %c1_i32  : i32 {
      %174 = arith.index_cast %arg24 : i32 to index
      %c0_113 = arith.constant 0 : index
      %c0_114 = arith.constant 0 : index
      %175 = vector.load %arg19[%174, %c0_113, %c0_114] : memref<4x8x8xbf16, #tpu.memory_space<vmem>>, vector<1x8x8xbf16>
      %176 = vector.shape_cast %175 : vector<1x8x8xbf16> to vector<8x8xbf16>
      %177 = arith.index_cast %arg24 : i32 to index
      %c0_115 = arith.constant 0 : index
      %c0_116 = arith.constant 0 : index
      %178 = vector.load %arg20[%177, %c0_115, %c0_116] : memref<4x8x8xbf16, #tpu.memory_space<vmem>>, vector<1x8x8xbf16>
      %179 = vector.shape_cast %178 : vector<1x8x8xbf16> to vector<8x8xbf16>
      %cst_117 = arith.constant dense<0.000000e+00> : vector<8x8xf32>
      %180 = tpu.matmul %176, %179, %cst_117 {dimension_numbers = #tpu.dot_dimension_numbers<[1], [1], [0], [0], [0, 0, 1, 0], [], []>} : vector<8x8xbf16>, vector<8x8xbf16>, vector<8x8xf32> -> vector<8x8xf32>
      %cst_118 = arith.constant 0.353553385 : f32
      %181 = vector.broadcast %cst_118 : f32 to vector<8x8xf32>
      %182 = arith.mulf %180, %181 : vector<8x8xf32>
      %183 = vector.broadcast %58 : vector<1x8xf32> to vector<8x8xf32>
      %184 = arith.addf %182, %183 : vector<8x8xf32>
      %cst_119 = arith.constant dense<0xFF800000> : vector<8xf32>
      %185 = vector.multi_reduction <maximumf>, %184, %cst_119 [1] : vector<8x8xf32> to vector<8xf32>
      %186 = vector.shape_cast %185 : vector<8xf32> to vector<8x1xf32>
      %187 = vector.broadcast %186 : vector<8x1xf32> to vector<8x8xf32>
      %188 = arith.subf %184, %187 : vector<8x8xf32>
      %189 = math.exp %188 : vector<8x8xf32>
      %cst_120 = arith.constant dense<0.000000e+00> : vector<8xf32>
      %190 = vector.multi_reduction <add>, %189, %cst_120 [1] : vector<8x8xf32> to vector<8xf32>
      %191 = vector.shape_cast %190 : vector<8xf32> to vector<8x1xf32>
      %192 = tpu.reciprocal %191 {approx = true} : vector<8x1xf32> -> vector<8x1xf32>
      %193 = vector.broadcast %192 : vector<8x1xf32> to vector<8x8xf32>
      %194 = arith.mulf %189, %193 : vector<8x8xf32>
      %195 = arith.truncf %194 : vector<8x8xf32> to vector<8x8xbf16>
      %196 = arith.index_cast %arg24 : i32 to index
      %c0_121 = arith.constant 0 : index
      %c0_122 = arith.constant 0 : index
      %197 = vector.load %arg21[%196, %c0_121, %c0_122] : memref<4x8x8xbf16, #tpu.memory_space<vmem>>, vector<1x8x8xbf16>
      %198 = vector.shape_cast %197 : vector<1x8x8xbf16> to vector<8x8xbf16>
      %cst_123 = arith.constant dense<0.000000e+00> : vector<8x8xf32>
      %199 = tpu.matmul %195, %198, %cst_123 {dimension_numbers = #tpu.dot_dimension_numbers<[1], [0], [0], [1], [0, 0, 1, 1], [], []>} : vector<8x8xbf16>, vector<8x8xbf16>, vector<8x8xf32> -> vector<8x8xf32>
      %200 = arith.truncf %199 : vector<8x8xf32> to vector<8x8xbf16>
      %201 = arith.index_cast %arg24 : i32 to index
      %c0_124 = arith.constant 0 : index
      %c0_125 = arith.constant 0 : index
      %202 = vector.load %arg22[%201, %c0_124, %c0_125] : memref<4x8x8xbf16, #tpu.memory_space<vmem>>, vector<1x8x8xbf16>
      %203 = vector.shape_cast %202 : vector<1x8x8xbf16> to vector<8x8xbf16>
      %204 = vector.shape_cast %200 : vector<8x8xbf16> to vector<1x8x8xbf16>
      tpu.vector_store %arg22[%201, %c0_124, %c0_125], %204 {strides = array<i32>} : memref<4x8x8xbf16, #tpu.memory_space<vmem>>, vector<1x8x8xbf16>,
    }
    %c4_i32_42 = arith.constant 4 : i32
    %c0_43 = arith.constant 0 : index
    %c0_44 = arith.constant 0 : index
    %c0_45 = arith.constant 0 : index
    %60 = vector.load %arg22[%c0_43, %c0_44, %c0_45] : memref<4x8x8xbf16, #tpu.memory_space<vmem>>, vector<1x8x8xbf16>
    %61 = vector.shape_cast %60 : vector<1x8x8xbf16> to vector<8x8xbf16>
    %c0_46 = arith.constant 0 : index
    %c0_47 = arith.constant 0 : index
    %62 = vector.load %arg23[%c0_46, %c0_47] : memref<8x32xbf16, #tpu.memory_space<vmem>>, vector<8x8xbf16>
    tpu.vector_store %arg23[%c0_46, %c0_47], %61 {strides = array<i32>} : memref<8x32xbf16, #tpu.memory_space<vmem>>, vector<8x8xbf16>,
    %c1_48 = arith.constant 1 : index
    %c0_49 = arith.constant 0 : index
    %c0_50 = arith.constant 0 : index
    %63 = vector.load %arg22[%c1_48, %c0_49, %c0_50] : memref<4x8x8xbf16, #tpu.memory_space<vmem>>, vector<1x8x8xbf16>
    %64 = vector.shape_cast %63 : vector<1x8x8xbf16> to vector<8x8xbf16>
    %c0_51 = arith.constant 0 : index
    %c8 = arith.constant 8 : index
    %65 = vector.load %arg23[%c0_51, %c8] : memref<8x32xbf16, #tpu.memory_space<vmem>>, vector<8x8xbf16>
    tpu.vector_store %arg23[%c0_51, %c8], %64 {strides = array<i32>} : memref<8x32xbf16, #tpu.memory_space<vmem>>, vector<8x8xbf16>,
    %c2_52 = arith.constant 2 : index
    %c0_53 = arith.constant 0 : index
    %c0_54 = arith.constant 0 : index
    %66 = vector.load %arg22[%c2_52, %c0_53, %c0_54] : memref<4x8x8xbf16, #tpu.memory_space<vmem>>, vector<1x8x8xbf16>
    %67 = vector.shape_cast %66 : vector<1x8x8xbf16> to vector<8x8xbf16>
    %c0_55 = arith.constant 0 : index
    %c16 = arith.constant 16 : index
    %68 = vector.load %arg23[%c0_55, %c16] : memref<8x32xbf16, #tpu.memory_space<vmem>>, vector<8x8xbf16>
    tpu.vector_store %arg23[%c0_55, %c16], %67 {strides = array<i32>} : memref<8x32xbf16, #tpu.memory_space<vmem>>, vector<8x8xbf16>,
    %c3_56 = arith.constant 3 : index
    %c0_57 = arith.constant 0 : index
    %c0_58 = arith.constant 0 : index
    %69 = vector.load %arg22[%c3_56, %c0_57, %c0_58] : memref<4x8x8xbf16, #tpu.memory_space<vmem>>, vector<1x8x8xbf16>
    %70 = vector.shape_cast %69 : vector<1x8x8xbf16> to vector<8x8xbf16>
    %c0_59 = arith.constant 0 : index
    %c24 = arith.constant 24 : index
    %71 = vector.load %arg23[%c0_59, %c24] : memref<8x32xbf16, #tpu.memory_space<vmem>>, vector<8x8xbf16>
    tpu.vector_store %arg23[%c0_59, %c24], %70 {strides = array<i32>} : memref<8x32xbf16, #tpu.memory_space<vmem>>, vector<8x8xbf16>,
    %c0_60 = arith.constant 0 : index
    %c0_61 = arith.constant 0 : index
    %72 = vector.load %arg23[%c0_60, %c0_61] : memref<8x32xbf16, #tpu.memory_space<vmem>>, vector<8x32xbf16>
    %c0_62 = arith.constant 0 : index
    %c0_63 = arith.constant 0 : index
    %73 = vector.load %arg5[%c0_62, %c0_63] : memref<32x32xbf16, #tpu.memory_space<vmem>>, vector<32x32xbf16>
    %cst_64 = arith.constant dense<0.000000e+00> : vector<8x32xf32>
    %74 = tpu.matmul %72, %73, %cst_64 {dimension_numbers = #tpu.dot_dimension_numbers<[1], [0], [0], [1], [0, 0, 1, 1], [], []>} : vector<8x32xbf16>, vector<32x32xbf16>, vector<8x32xf32> -> vector<8x32xf32>
    %c0_65 = arith.constant 0 : index
    %c0_66 = arith.constant 0 : index
    %75 = vector.load %arg6[%c0_65, %c0_66] : memref<1x32xf32, #tpu.memory_space<vmem>>, vector<1x32xf32>
    %76 = vector.broadcast %75 : vector<1x32xf32> to vector<8x32xf32>
    %77 = arith.addf %74, %76 : vector<8x32xf32>
    %78 = arith.addf %1, %77 : vector<8x32xf32>
    %c0_67 = arith.constant 0 : index
    %c0_68 = arith.constant 0 : index
    %79 = vector.load %arg7[%c0_67, %c0_68] : memref<1x32xf32, #tpu.memory_space<vmem>>, vector<1x32xf32>
    %c0_69 = arith.constant 0 : index
    %c0_70 = arith.constant 0 : index
    %80 = vector.load %arg8[%c0_69, %c0_70] : memref<1x32xf32, #tpu.memory_space<vmem>>, vector<1x32xf32>
    %cst_71 = arith.constant dense<0.000000e+00> : vector<8xf32>
    %81 = vector.multi_reduction <add>, %78, %cst_71 [1] : vector<8x32xf32> to vector<8xf32>
    %82 = vector.shape_cast %81 : vector<8xf32> to vector<8x1xf32>
    %cst_72 = arith.constant 3.200000e+01 : f32
    %83 = vector.broadcast %cst_72 : f32 to vector<8x1xf32>
    %84 = arith.divf %82, %83 : vector<8x1xf32>
    %85 = vector.broadcast %84 : vector<8x1xf32> to vector<8x32xf32>
    %86 = arith.subf %78, %85 : vector<8x32xf32>
    %87 = arith.mulf %86, %86 : vector<8x32xf32>
    %cst_73 = arith.constant dense<0.000000e+00> : vector<8xf32>
    %88 = vector.multi_reduction <add>, %87, %cst_73 [1] : vector<8x32xf32> to vector<8xf32>
    %89 = vector.shape_cast %88 : vector<8xf32> to vector<8x1xf32>
    %cst_74 = arith.constant 3.200000e+01 : f32
    %90 = vector.broadcast %cst_74 : f32 to vector<8x1xf32>
    %91 = arith.divf %89, %90 : vector<8x1xf32>
    %92 = vector.broadcast %84 : vector<8x1xf32> to vector<8x32xf32>
    %93 = arith.subf %78, %92 : vector<8x32xf32>
    %cst_75 = arith.constant 9.99999996E-13 : f32
    %94 = vector.broadcast %cst_75 : f32 to vector<8x1xf32>
    %95 = arith.addf %91, %94 : vector<8x1xf32>
    %96 = math.rsqrt %95 : vector<8x1xf32>
    %97 = vector.broadcast %96 : vector<8x1xf32> to vector<8x32xf32>
    %98 = arith.mulf %93, %97 : vector<8x32xf32>
    %99 = vector.broadcast %79 : vector<1x32xf32> to vector<8x32xf32>
    %100 = arith.mulf %98, %99 : vector<8x32xf32>
    %101 = vector.broadcast %80 : vector<1x32xf32> to vector<8x32xf32>
    %102 = arith.addf %100, %101 : vector<8x32xf32>
    %103 = arith.truncf %102 : vector<8x32xf32> to vector<8x32xbf16>
    %c0_76 = arith.constant 0 : index
    %c0_77 = arith.constant 0 : index
    %104 = vector.load %arg9[%c0_76, %c0_77] : memref<32x64xbf16, #tpu.memory_space<vmem>>, vector<32x64xbf16>
    %cst_78 = arith.constant dense<0.000000e+00> : vector<8x64xf32>
    %105 = tpu.matmul %103, %104, %cst_78 {dimension_numbers = #tpu.dot_dimension_numbers<[1], [0], [0], [1], [0, 0, 1, 1], [], []>} : vector<8x32xbf16>, vector<32x64xbf16>, vector<8x64xf32> -> vector<8x64xf32>
    %c0_79 = arith.constant 0 : index
    %c0_80 = arith.constant 0 : index
    %106 = vector.load %arg10[%c0_79, %c0_80] : memref<1x64xf32, #tpu.memory_space<vmem>>, vector<1x64xf32>
    %107 = vector.broadcast %106 : vector<1x64xf32> to vector<8x64xf32>
    %108 = arith.addf %105, %107 : vector<8x64xf32>
    %cst_81 = arith.constant 5.000000e-01 : f32
    %109 = vector.broadcast %cst_81 : f32 to vector<8x64xf32>
    %110 = arith.mulf %109, %108 : vector<8x64xf32>
    %cst_82 = arith.constant 4.471500e-02 : f32
    %111 = vector.broadcast %cst_82 : f32 to vector<8x64xf32>
    %112 = arith.mulf %111, %108 : vector<8x64xf32>
    %113 = arith.mulf %112, %108 : vector<8x64xf32>
    %114 = arith.mulf %113, %108 : vector<8x64xf32>
    %115 = arith.addf %108, %114 : vector<8x64xf32>
    %cst_83 = arith.constant 0.797884583 : f32
    %116 = vector.broadcast %cst_83 : f32 to vector<8x64xf32>
    %117 = arith.mulf %116, %115 : vector<8x64xf32>
    %118 = math.tanh %117 : vector<8x64xf32>
    %cst_84 = arith.constant 1.000000e+00 : f32
    %119 = vector.broadcast %cst_84 : f32 to vector<8x64xf32>
    %120 = arith.addf %119, %118 : vector<8x64xf32>
    %121 = arith.mulf %110, %120 : vector<8x64xf32>
    %122 = arith.truncf %121 : vector<8x64xf32> to vector<8x64xbf16>
    %c0_85 = arith.constant 0 : index
    %c0_86 = arith.constant 0 : index
    %123 = vector.load %arg11[%c0_85, %c0_86] : memref<64x32xbf16, #tpu.memory_space<vmem>>, vector<64x32xbf16>
    %cst_87 = arith.constant dense<0.000000e+00> : vector<8x32xf32>
    %124 = tpu.matmul %122, %123, %cst_87 {dimension_numbers = #tpu.dot_dimension_numbers<[1], [0], [0], [1], [0, 0, 1, 1], [], []>} : vector<8x64xbf16>, vector<64x32xbf16>, vector<8x32xf32> -> vector<8x32xf32>
    %c0_88 = arith.constant 0 : index
    %c0_89 = arith.constant 0 : index
    %125 = vector.load %arg12[%c0_88, %c0_89] : memref<1x32xf32, #tpu.memory_space<vmem>>, vector<1x32xf32>
    %126 = vector.broadcast %125 : vector<1x32xf32> to vector<8x32xf32>
    %127 = arith.addf %124, %126 : vector<8x32xf32>
    %128 = arith.addf %102, %127 : vector<8x32xf32>
    %c0_90 = arith.constant 0 : index
    %c0_91 = arith.constant 0 : index
    %129 = vector.load %arg13[%c0_90, %c0_91] : memref<1x32xf32, #tpu.memory_space<vmem>>, vector<1x32xf32>
    %c0_92 = arith.constant 0 : index
    %c0_93 = arith.constant 0 : index
    %130 = vector.load %arg14[%c0_92, %c0_93] : memref<1x32xf32, #tpu.memory_space<vmem>>, vector<1x32xf32>
    %cst_94 = arith.constant dense<0.000000e+00> : vector<8xf32>
    %131 = vector.multi_reduction <add>, %128, %cst_94 [1] : vector<8x32xf32> to vector<8xf32>
    %132 = vector.shape_cast %131 : vector<8xf32> to vector<8x1xf32>
    %cst_95 = arith.constant 3.200000e+01 : f32
    %133 = vector.broadcast %cst_95 : f32 to vector<8x1xf32>
    %134 = arith.divf %132, %133 : vector<8x1xf32>
    %135 = vector.broadcast %134 : vector<8x1xf32> to vector<8x32xf32>
    %136 = arith.subf %128, %135 : vector<8x32xf32>
    %137 = arith.mulf %136, %136 : vector<8x32xf32>
    %cst_96 = arith.constant dense<0.000000e+00> : vector<8xf32>
    %138 = vector.multi_reduction <add>, %137, %cst_96 [1] : vector<8x32xf32> to vector<8xf32>
    %139 = vector.shape_cast %138 : vector<8xf32> to vector<8x1xf32>
    %cst_97 = arith.constant 3.200000e+01 : f32
    %140 = vector.broadcast %cst_97 : f32 to vector<8x1xf32>
    %141 = arith.divf %139, %140 : vector<8x1xf32>
    %142 = vector.broadcast %134 : vector<8x1xf32> to vector<8x32xf32>
    %143 = arith.subf %128, %142 : vector<8x32xf32>
    %cst_98 = arith.constant 9.99999996E-13 : f32
    %144 = vector.broadcast %cst_98 : f32 to vector<8x1xf32>
    %145 = arith.addf %141, %144 : vector<8x1xf32>
    %146 = math.rsqrt %145 : vector<8x1xf32>
    %147 = vector.broadcast %146 : vector<8x1xf32> to vector<8x32xf32>
    %148 = arith.mulf %143, %147 : vector<8x32xf32>
    %149 = vector.broadcast %129 : vector<1x32xf32> to vector<8x32xf32>
    %150 = arith.mulf %148, %149 : vector<8x32xf32>
    %151 = vector.broadcast %130 : vector<1x32xf32> to vector<8x32xf32>
    %152 = arith.addf %150, %151 : vector<8x32xf32>
    %c0_99 = arith.constant 0 : index
    %c0_100 = arith.constant 0 : index
    %c0_101 = arith.constant 0 : index
    %153 = vector.load %arg17[%c0_99, %c0_100, %c0_101] : memref<1x8x32xf32, #tpu.memory_space<vmem>>, vector<1x8x32xf32>
    %154 = vector.shape_cast %153 : vector<1x8x32xf32> to vector<8x32xf32>
    %155 = vector.shape_cast %152 : vector<8x32xf32> to vector<1x8x32xf32>
    tpu.vector_store %arg17[%c0_99, %c0_100, %c0_101], %155 {strides = array<i32>} : memref<1x8x32xf32, #tpu.memory_space<vmem>>, vector<1x8x32xf32>,
    %c0_102 = arith.constant 0 : index
    %c0_103 = arith.constant 0 : index
    %156 = vector.load %arg15[%c0_102, %c0_103] : memref<1x32xf32, #tpu.memory_space<vmem>>, vector<1x32xf32>
    %157 = vector.broadcast %156 : vector<1x32xf32> to vector<8x32xf32>
    %158 = arith.mulf %152, %157 : vector<8x32xf32>
    %cst_104 = arith.constant dense<0.000000e+00> : vector<8xf32>
    %159 = vector.multi_reduction <add>, %158, %cst_104 [1] : vector<8x32xf32> to vector<8xf32>
    %160 = vector.shape_cast %159 : vector<8xf32> to vector<8x1xf32>
    %c0_105 = arith.constant 0 : index
    %c0_106 = arith.constant 0 : index
    %161 = vector.load %arg16[%c0_105, %c0_106] : memref<1x1xf32, #tpu.memory_space<vmem>>, vector<1x1xf32>
    %162 = vector.broadcast %161 : vector<1x1xf32> to vector<8x1xf32>
    %163 = arith.addf %160, %162 : vector<8x1xf32>
    %cst_107 = arith.constant 0.000000e+00 : f32
    %164 = vector.broadcast %cst_107 : f32 to vector<8x1xf32>
    %165 = arith.subf %164, %163 : vector<8x1xf32>
    %166 = math.exp %165 : vector<8x1xf32>
    %cst_108 = arith.constant 1.000000e+00 : f32
    %167 = vector.broadcast %cst_108 : f32 to vector<8x1xf32>
    %168 = arith.addf %167, %166 : vector<8x1xf32>
    %cst_109 = arith.constant 1.000000e+00 : f32
    %169 = vector.broadcast %cst_109 : f32 to vector<8x1xf32>
    %170 = arith.divf %169, %168 : vector<8x1xf32>
    %c0_110 = arith.constant 0 : index
    %c0_111 = arith.constant 0 : index
    %c0_112 = arith.constant 0 : index
    %171 = vector.load %arg18[%c0_110, %c0_111, %c0_112] : memref<1x8x1xf32, #tpu.memory_space<vmem>>, vector<1x8x1xf32>
    %172 = vector.shape_cast %171 : vector<1x8x1xf32> to vector<8x1xf32>
    %173 = vector.shape_cast %170 : vector<8x1xf32> to vector<1x8x1xf32>
    tpu.vector_store %arg18[%c0_110, %c0_111, %c0_112], %173 {strides = array<i32>} : memref<1x8x1xf32, #tpu.memory_space<vmem>>, vector<1x8x1xf32>,
    return
  }
  func.func @transform_0(%arg0: i32) -> (i32, i32, i32) {
    %c0_i32 = arith.constant 0 : i32
    %c0_i32_0 = arith.constant 0 : i32
    %c0_i32_1 = arith.constant 0 : i32
    return %arg0, %c0_i32, %c0_i32_0 : i32, i32, i32
  }
  func.func @transform_1(%arg0: i32) -> (i32, i32, i32) {
    %c0_i32 = arith.constant 0 : i32
    %c0_i32_0 = arith.constant 0 : i32
    %c0_i32_1 = arith.constant 0 : i32
    return %arg0, %c0_i32, %c0_i32_0 : i32, i32, i32
  }
  func.func @transform_2(%arg0: i32) -> (i32, i32) {
    %c0_i32 = arith.constant 0 : i32
    %c0_i32_0 = arith.constant 0 : i32
    %c0_i32_1 = arith.constant 0 : i32
    return %c0_i32, %c0_i32_0 : i32, i32
  }
  func.func @transform_3(%arg0: i32) -> (i32, i32) {
    %c0_i32 = arith.constant 0 : i32
    %c0_i32_0 = arith.constant 0 : i32
    %c0_i32_1 = arith.constant 0 : i32
    return %c0_i32, %c0_i32_0 : i32, i32
  }
  func.func @transform_4(%arg0: i32) -> (i32, i32) {
    %c0_i32 = arith.constant 0 : i32
    %c0_i32_0 = arith.constant 0 : i32
    %c0_i32_1 = arith.constant 0 : i32
    return %c0_i32, %c0_i32_0 : i32, i32
  }
  func.func @transform_5(%arg0: i32) -> (i32, i32) {
    %c0_i32 = arith.constant 0 : i32
    %c0_i32_0 = arith.constant 0 : i32
    %c0_i32_1 = arith.constant 0 : i32
    return %c0_i32, %c0_i32_0 : i32, i32
  }
  func.func @transform_6(%arg0: i32) -> (i32, i32) {
    %c0_i32 = arith.constant 0 : i32
    %c0_i32_0 = arith.constant 0 : i32
    %c0_i32_1 = arith.constant 0 : i32
    return %c0_i32, %c0_i32_0 : i32, i32
  }
  func.func @transform_7(%arg0: i32) -> (i32, i32) {
    %c0_i32 = arith.constant 0 : i32
    %c0_i32_0 = arith.constant 0 : i32
    %c0_i32_1 = arith.constant 0 : i32
    return %c0_i32, %c0_i32_0 : i32, i32
  }
  func.func @transform_8(%arg0: i32) -> (i32, i32) {
    %c0_i32 = arith.constant 0 : i32
    %c0_i32_0 = arith.constant 0 : i32
    %c0_i32_1 = arith.constant 0 : i32
    return %c0_i32, %c0_i32_0 : i32, i32
  }
  func.func @transform_9(%arg0: i32) -> (i32, i32) {
    %c0_i32 = arith.constant 0 : i32
    %c0_i32_0 = arith.constant 0 : i32
    %c0_i32_1 = arith.constant 0 : i32
    return %c0_i32, %c0_i32_0 : i32, i32
  }
  func.func @transform_10(%arg0: i32) -> (i32, i32) {
    %c0_i32 = arith.constant 0 : i32
    %c0_i32_0 = arith.constant 0 : i32
    %c0_i32_1 = arith.constant 0 : i32
    return %c0_i32, %c0_i32_0 : i32, i32
  }
  func.func @transform_11(%arg0: i32) -> (i32, i32) {
    %c0_i32 = arith.constant 0 : i32
    %c0_i32_0 = arith.constant 0 : i32
    %c0_i32_1 = arith.constant 0 : i32
    return %c0_i32, %c0_i32_0 : i32, i32
  }
  func.func @transform_12(%arg0: i32) -> (i32, i32) {
    %c0_i32 = arith.constant 0 : i32
    %c0_i32_0 = arith.constant 0 : i32
    %c0_i32_1 = arith.constant 0 : i32
    return %c0_i32, %c0_i32_0 : i32, i32
  }
  func.func @transform_13(%arg0: i32) -> (i32, i32) {
    %c0_i32 = arith.constant 0 : i32
    %c0_i32_0 = arith.constant 0 : i32
    %c0_i32_1 = arith.constant 0 : i32
    return %c0_i32, %c0_i32_0 : i32, i32
  }
  func.func @transform_14(%arg0: i32) -> (i32, i32) {
    %c0_i32 = arith.constant 0 : i32
    %c0_i32_0 = arith.constant 0 : i32
    %c0_i32_1 = arith.constant 0 : i32
    return %c0_i32, %c0_i32_0 : i32, i32
  }
  func.func @transform_15(%arg0: i32) -> (i32, i32) {
    %c0_i32 = arith.constant 0 : i32
    %c0_i32_0 = arith.constant 0 : i32
    %c0_i32_1 = arith.constant 0 : i32
    return %c0_i32, %c0_i32_0 : i32, i32
  }
  func.func @transform_16(%arg0: i32) -> (i32, i32, i32) {
    %c0_i32 = arith.constant 0 : i32
    %c0_i32_0 = arith.constant 0 : i32
    %c0_i32_1 = arith.constant 0 : i32
    return %arg0, %c0_i32, %c0_i32_0 : i32, i32, i32
  }
  func.func @transform_17(%arg0: i32) -> (i32, i32, i32) {
    %c0_i32 = arith.constant 0 : i32
    %c0_i32_0 = arith.constant 0 : i32
    %c0_i32_1 = arith.constant 0 : i32
    return %arg0, %c0_i32, %c0_i32_0 : i32, i32, i32
  }
}

module attributes {stable_mosaic.version = 11 : i64} {
  func.func @heads_kernel(%arg0: memref<2x32xf32, #tpu.memory_space<vmem>>, %arg1: memref<32x32xbf16, #tpu.memory_space<vmem>>, %arg2: memref<1x32xf32, #tpu.memory_space<vmem>>, %arg3: memref<32x3xbf16, #tpu.memory_space<vmem>>, %arg4: memref<1x3xf32, #tpu.memory_space<vmem>>, %arg5: memref<2x3xf32, #tpu.memory_space<vmem>>) attributes {dimension_semantics = [], scalar_prefetch = 0 : i64, scratch_operands = 0 : i64, tpu.core_type = #tpu.core_type<tc>} {
    %c0 = arith.constant 0 : index
    %c0_0 = arith.constant 0 : index
    %0 = vector.load %arg0[%c0, %c0_0] : memref<2x32xf32, #tpu.memory_space<vmem>>, vector<2x32xf32>
    %1 = arith.truncf %0 : vector<2x32xf32> to vector<2x32xbf16>
    %c0_1 = arith.constant 0 : index
    %c0_2 = arith.constant 0 : index
    %2 = vector.load %arg1[%c0_1, %c0_2] : memref<32x32xbf16, #tpu.memory_space<vmem>>, vector<32x32xbf16>
    %cst = arith.constant dense<0.000000e+00> : vector<2x32xf32>
    %3 = tpu.matmul %1, %2, %cst {dimension_numbers = #tpu.dot_dimension_numbers<[1], [0], [0], [1], [0, 0, 1, 1], [], []>} : vector<2x32xbf16>, vector<32x32xbf16>, vector<2x32xf32> -> vector<2x32xf32>
    %c0_3 = arith.constant 0 : index
    %c0_4 = arith.constant 0 : index
    %4 = vector.load %arg2[%c0_3, %c0_4] : memref<1x32xf32, #tpu.memory_space<vmem>>, vector<1x32xf32>
    %5 = vector.broadcast %4 : vector<1x32xf32> to vector<2x32xf32>
    %6 = arith.addf %3, %5 : vector<2x32xf32>
    %7 = math.tanh %6 : vector<2x32xf32>
    %8 = arith.truncf %7 : vector<2x32xf32> to vector<2x32xbf16>
    %c0_5 = arith.constant 0 : index
    %c0_6 = arith.constant 0 : index
    %9 = vector.load %arg3[%c0_5, %c0_6] : memref<32x3xbf16, #tpu.memory_space<vmem>>, vector<32x3xbf16>
    %cst_7 = arith.constant dense<0.000000e+00> : vector<2x3xf32>
    %10 = tpu.matmul %8, %9, %cst_7 {dimension_numbers = #tpu.dot_dimension_numbers<[1], [0], [0], [1], [0, 0, 1, 1], [], []>} : vector<2x32xbf16>, vector<32x3xbf16>, vector<2x3xf32> -> vector<2x3xf32>
    %c0_8 = arith.constant 0 : index
    %c0_9 = arith.constant 0 : index
    %11 = vector.load %arg4[%c0_8, %c0_9] : memref<1x3xf32, #tpu.memory_space<vmem>>, vector<1x3xf32>
    %12 = vector.broadcast %11 : vector<1x3xf32> to vector<2x3xf32>
    %13 = arith.addf %10, %12 : vector<2x3xf32>
    %c0_10 = arith.constant 0 : index
    %c0_11 = arith.constant 0 : index
    %14 = vector.load %arg5[%c0_10, %c0_11] : memref<2x3xf32, #tpu.memory_space<vmem>>, vector<2x3xf32>
    tpu.vector_store %arg5[%c0_10, %c0_11], %13 {strides = array<i32>} : memref<2x3xf32, #tpu.memory_space<vmem>>, vector<2x3xf32>,
    return
  }
}

</mosaic_0001>

<bundles_post_ra>
// kernel: bert2bert_forward.7
= control target key start
LH: loop header
LB: loop body
LE: loop exit
PB: predicated region body
PF: predicated region fallthrough
CT: control target
= control target key end

     0   :  { %v202_v0 = vmov 0.0   ;;  %vm203_vm0 = vmmov 0   ;;  %vm46_vm1 = vcmask 261120   ;;  %vm158_vm2 = vcmask 17408   ;;  %s260_s1 = inlined_call_operand.vmem [shape: bf16[32,32], index: 1, kind: input, shape index: {}]   ;;  %s261_s0 = inlined_call_operand.vmem [shape: f32[2,32], index: 0, kind: input, shape index: {}]   ;;  %s262_s3 = inlined_call_operand.vmem [shape: bf16[32,3], index: 3, kind: input, shape index: {}]   ;;  %s263_s2 = inlined_call_operand.vmem [shape: f32[1,32], index: 2, kind: input, shape index: {}]   ;;  %s264_s4 = inlined_call_operand.vmem [shape: f32[1,3], index: 4, kind: input, shape index: {}]   ;;  %s265_s5 = inlined_call_operand.vmem [shape: f32[2,3], index: 5, kind: output, shape index: {}]  }
   0x1   :  { %178 = vmatprep.subr.bf16.mxu0 %v202_v0  ;;  %v196_v1 = vld [vmem:[%s260_s1] sm:$0xff]   ;;  %182 = vmatprep.mubr.msk.bf16.mxu0 %vm203_vm0, %v202_v0  ;;  %v197_v2 = vld [vmem:[%s260_s1 + $0x8] sm:$0xff]  }
   0x2   :  { %186 = vmatprep.subr.bf16.mxu1 %v202_v0  ;;  %190 = vmatprep.mubr.msk.bf16.mxu1 %vm203_vm0, %v202_v0  ;;  %v21_v3 = vld [vmem:[%s261_s0] sm:$0x3]  ;;  %v199_v6 = vld [vmem:[%s262_s3 + $0x8] sm:$0xff]  }
   0x3   :  { %179 = vmatpush3.bf16.msra.mxu0 %v196_v1  ;;  %v22_v4 = vpack.c.bf16 %v21_v3, %v21_v3  ;;  %v198_v5 = vld [vmem:[%s262_s3] sm:$0xff]  }
   0x4   :  { %180 = vmatprep.subr.bf16.mxu0 %v202_v0  ;;  %187 = vmatpush3.bf16.msra.mxu1 %v198_v5  ;;  %v164_v7 = vld [vmem:[%s263_s2] ss:$0 sm:$0xff] }
   0x5   :  { %188 = vmatprep.subr.bf16.mxu1 %v202_v0  ;;  %v168_v15 = vld [vmem:[%s264_s4] ss:$0 sm:$0xff] }
   0x7   :  { %181 = vmatpush3.bf16.msra.mxu0 %v197_v2 }
   0x8   :  { %189 = vmatpush3.bf16.msra.mxu1 %v199_v6 }
   0xa   :  { %183 = vmatmul.mubr.msk.bf16.vlgmr.msra.gmra.mrb[0].mxu0 %vm46_vm1, %v22_v4 }
  0xdd   :  { %v84_v8 = vpop.f32.mrb[0].mxu0 }
  0xde   :  { %v85_v9 = vadd.f32 %v164_v7, %v84_v8  ;;  %v184_v10 = vpop.f32.mrb[1].mxu0 }
  0xdf   :  { %v87_v11 = vpop.f32.mrb[2].mxu0 }
  0xe0   :  { %200 = vtanh.f32 %v85_v9  ;;  %v185_v12 = vpop.f32.mrb[3].mxu0 }
  0xea   :  { %v201_v13 = vpop.eup %200 }
  0xeb   :  { %v91_v14 = vpack.c.bf16 %v201_v13, %v201_v13 }
  0xed   :  { %191 = vmatmul.mubr.msk.bf16.vlgmr.msra.gmra.mrb[0].mxu1 %vm46_vm1, %v91_v14 }
 0x1c0   :  { %v152_v16 = vpop.f32.mrb[0].mxu1 }
 0x1c1   :  { %v153_v17 = vadd.f32 %v168_v15, %v152_v16  ;;  %v192_v18 = vpop.f32.mrb[1].mxu1 }
 0x1c2   :  { %v155_v19 = vpop.f32.mrb[2].mxu1 }
 0x1c3   :  { %159 = vst.msk [vmem:[%s265_s5] sm:$0x3] %vm158_vm2, %v153_v17  ;;  %v193_v20 = vpop.f32.mrb[3].mxu1 }

// kernel: bert2bert_forward.4
= control target key start
LH: loop header
LB: loop body
LE: loop exit
PB: predicated region body
PF: predicated region fallthrough
CT: control target
= control target key end

     0   :  { %s376_s18 = smov 0   ;;  %s408_s0 = inlined_call_operand.vmem [shape: f32[2,8,32], index: 0, kind: input, shape index: {}]   ;;  %s409_s1 = inlined_call_operand.vmem [shape: f32[8,32], index: 1, kind: input, shape index: {}]   ;;  %s410_s2 = inlined_call_operand.vmem [shape: f32[1,32], index: 2, kind: input, shape index: {}]   ;;  %s411_s3 = inlined_call_operand.vmem [shape: f32[1,32], index: 3, kind: input, shape index: {}]   ;;  %s412_s4 = inlined_call_operand.vmem [shape: f32[1,32], index: 4, kind: input, shape index: {}]   ;;  %s413_s5 = inlined_call_operand.vmem [shape: f32[2,8,32], index: 5, kind: output, shape index: {}]  }
   0x1 LB: > { %s316_s19 = sadd.s32 4294967295, %s344_s18   ;;  %p320_p0 = scmp.ge.s32.totalorder %s344_s18, 1  ;;  %s344_s18 = sphi %s376_s18, %s15_s18  }
   0x2   : > { %p186_p1 = scmp.lt.s32.totalorder %s344_s18, 3 }
   0x4   : > { %p187_p2 = pnand %p320_p0, %p186_p1 }
   0x5   : > { %p212_p3 = scmp.lt.s32.totalorder (!%p187_p2), %s316_s19, 1  ;;  %v221_v0 = vld [vmem:[%s409_s1] sm:$0xff] (!%p187_p2)  ;;  %vm233_vm0 = vcmask (!%p187_p2), 261120  }
   0x6   : > { %190 = sbr.rel (%p187_p2) target bundleno = 335 (0x14f), region = 40  ;;  %v323_v2 = vld [vmem:[%s410_s2] ss:$0 sm:$0xff] (!%p187_p2) }
   0x7   : > { %v324_v15 = vld [vmem:[%s411_s3] ss:$0 sm:$0xff] (!%p187_p2) }
   0x8   : > { %v325_v17 = vld [vmem:[%s412_s4] ss:$0 sm:$0xff] (!%p187_p2) }
   0xd   : > { %s415_s19 = smov (!%p212_p3, %s316_s19), 1 }
   0xe   : > { %s321_s20 = sshll.u32 %s415_s19, 3 }
   0xf   : > { %s215_s25 = scalar_lea.vmem %s408_s0, %s321_s20  ;;  %s219_s9 = scalar_lea.vmem %s413_s5, %s321_s20 }
  0x10   : > { %v220_v1 = vld [vmem:[%s215_s25] sm:$0xff] }
  0x11   : > { %v222_v3 = vadd.f32 %v221_v0, %v220_v1 }
  0x13   : > { %v230_v4 = vadd.f32 %v323_v2, %v222_v3 }
  0x15   : > { %v234_v5 = vsel %vm233_vm0, %v230_v4, 0.0 }
  0x16   : > { %235 = vadd.xlane.f32.xlu0 %v234_v5 }
  0xa3   : > { %v236_v6 = vpop.xlane.xlu0 %235 }
  0xa4   : > { %v238_v7 = vmul.f32 0.03125, %v236_v6 }
  0xa6   : > { %v239_v8 = vsub.f32 %v230_v4, %v238_v7 }
  0xa8   : > { %v240_v9 = vmul.f32 %v239_v8, %v239_v8 }
  0xaa   : > { %v241_v10 = vsel %vm233_vm0, %v240_v9, 0.0 }
  0xab   : > { %242 = vadd.xlane.f32.xlu0 %v241_v10 }
 0x138   : > { %v243_v11 = vpop.xlane.xlu0 %242 }
 0x139   : > { %v244_v12 = vmul.f32 0.03125, %v243_v11 }
 0x13b   : > { %v245_v13 = vadd.f32 1e-12, %v244_v12 }
 0x13d   : > { %336 = vrsqrt.f32 %v245_v13 }
 0x147   : > { %v337_v14 = vpop.eup %336 }
 0x148   : > { %v247_v16 = vmul.f32 %v337_v14, %v239_v8 }
 0x14a   : > { %v254_v18 = vmul.f32 %v324_v15, %v247_v16 }
 0x14c   : > { %v261_v19 = vadd.f32 %v325_v17, %v254_v18 }
 0x14e   : > { %262 = vst.msk [vmem:[%s219_s9] sm:$0xff] %vm233_vm0, %v261_v19 }
 0x14f PF: > { %s15_s18 = sadd.s32 1, %s344_s18  }
 0x150   : > { %p12_p4 = scmp.ge.s32.totalorder %s15_s18, 4  }
 0x152   :  { %14 = sbr.rel (!%p12_p4) target bundleno = 1 (0x1), region = 70 }

// kernel: bert2bert_forward.5
= control target key start
LH: loop header
LB: loop body
LE: loop exit
PB: predicated region body
PF: predicated region fallthrough
CT: control target
= control target key end

     0   :  { %s1399_s29 = smov 0   ;;  %s1544_s0 = inlined_call_operand.vmem [shape: f32[2,8,32], index: 0, kind: input, shape index: {}]   ;;  %s1545_s1 = inlined_call_operand.vmem [shape: f32[2,1,8], index: 1, kind: input, shape index: {}]   ;;  %s1546_s2 = inlined_call_operand.vmem [shape: bf16[32,96], index: 2, kind: input, shape index: {}]   ;;  %s1547_s3 = inlined_call_operand.vmem [shape: f32[1,96], index: 3, kind: input, shape index: {}]   ;;  %s1548_s4 = inlined_call_operand.vmem [shape: bf16[32,32], index: 4, kind: input, shape index: {}]   ;;  %s1549_s5 = inlined_call_operand.vmem [shape: f32[1,32], index: 5, kind: input, shape index: {}]   ;;  %s1550_s6 = inlined_call_operand.vmem [shape: f32[1,32], index: 6, kind: input, shape index: {}]   ;;  %s1551_s7 = inlined_call_operand.vmem [shape: f32[1,32], index: 7, kind: input, shape index: {}]   ;;  %s1552_s8 = inlined_call_operand.vmem [shape: bf16[32,64], index: 8, kind: input, shape index: {}]   ;;  %s1553_s9 = inlined_call_operand.vmem [shape: f32[1,64], index: 9, kind: input, shape index: {}]   ;;  %s1554_s10 = inlined_call_operand.vmem [shape: bf16[64,32], index: 10, kind: input, shape index: {}]   ;;  %s1555_s11 = inlined_call_operand.vmem [shape: f32[1,32], index: 11, kind: input, shape index: {}]   ;;  %s1556_s12 = inlined_call_operand.vmem [shape: f32[1,32], index: 12, kind: input, shape index: {}]   ;;  %s1557_s13 = inlined_call_operand.vmem [shape: f32[1,32], index: 13, kind: input, shape index: {}]   ;;  %s1558_s14 = inlined_call_operand.vmem [shape: f32[2,8,32], index: 14, kind: output, shape index: {}]  }
   0x1 LB: > { %s1130_s30 = sadd.s32 4294967295, %s1300_s29   ;;  %p1134_p0 = scmp.ge.s32.totalorder %s1300_s29, 1  ;;  %s1300_s29 = sphi %s1399_s29, %s24_s29  }
   0x2   : > { %p419_p1 = scmp.lt.s32.totalorder %s1300_s29, 3 }
   0x4   : > { %p420_p2 = pnand %p1134_p0, %p419_p1 }
   0x5   : > { %v1270_v0 = vld [vmem:[%s1546_s2] sm:$0xff] (!%p420_p2)   ;;  %v1306_v1 = vmov (!%p420_p2), 0.0   ;;  %v1271_v2 = vld [vmem:[%s1546_s2 + $0x8] sm:$0xff] (!%p420_p2)   ;;  %vm1307_vm0 = vmmov (!%p420_p2), 0   ;;  %p466_p3 = scmp.lt.s32.totalorder (!%p420_p2), %s1130_s30, 1  ;;  %vm503_vm1 = vcmask (!%p420_p2), 261120  }
   0x6   : > { %423 = sbr.rel (%p420_p2) target bundleno = 2566 (0xa06), region = 76  ;;  %1188 = vmatprep.subr.bf16.mxu0 (!%p420_p2), %v1306_v1  ;;  %1192 = vmatprep.mubr.msk.bf16.mxu0 (!%p420_p2), %vm1307_vm0, %v1306_v1  ;;  %v1137_v6 = vld [vmem:[%s1547_s3] ss:$0 sm:$0xff] (!%p420_p2)  ;;  %vm548_vm2 = vcmask (!%p420_p2), 60416   ;;  %s1308_s16 = smov (!%p420_p2), 120  }
   0x7   : > { %1189 = vmatpush3.bf16.msra.mxu0 (!%p420_p2), %v1270_v0  ;;  %s1309_s17 = smov (!%p420_p2), 96   ;;  %s1310_s18 = smov (!%p420_p2), 88  }
   0x8   : > { %1190 = vmatprep.subr.bf16.mxu0 (!%p420_p2), %v1306_v1  ;;  %s1312_s20 = smov (!%p420_p2), 112   ;;  %s1313_s21 = smov (!%p420_p2), 56  }
   0x9   : > { %s1315_s23 = smov (!%p420_p2), 80   ;;  %s1316_s24 = smov (!%p420_p2), 72  }
   0xa   : > { %s1318_s26 = smov (!%p420_p2), 40   ;;  %s1450_s27 = smov (!%p420_p2), 0  }
   0xb   : > { %1191 = vmatpush3.bf16.msra.mxu0 (!%p420_p2), %v1271_v2 }
   0xd   : > { %s1560_s30 = smov (!%p466_p3, %s1130_s30), 1 }
   0xe   : > { %s1135_s19 = sshll.u32 %s1560_s30, 3  ;;  %s472_s22 = scalar_lea.vmem %s1545_s1, %s1560_s30 }
   0xf   : > { %s469_s25 = scalar_lea.vmem %s1544_s0, %s1135_s19  ;;  %s1426_s28 = scalar_lea.vmem %s1558_s14, %s1135_s19  ;;  %v1428_v3 = vld [vmem:[%s472_s22] ss:$0 sm:$0xff] }
  0x10   : > { %v1430_v4 = vld [vmem:[%s469_s25] sm:$0xff]  ;;  %s1311_s19 = smov 64   ;;  %s1314_s22 = smov 48  }
  0x11   : > { %v479_v5 = vpack.c.bf16 %v1430_v4, %v1430_v4  ;;  %s1317_s25 = smov 104  }
  0x13   : > { %1193 = vmatmul.mubr.msk.bf16.vlgmr.msra.gmra.mrb[0].mxu0 %vm503_vm1, %v479_v5 }
  0xe6   : > { %v541_v7 = vpop.f32.mrb[0].mxu0 }
  0xe7   : > { %v542_v8 = vadd.f32 %v1137_v6, %v541_v7  ;;  %v1194_v9 = vpop.f32.mrb[1].mxu0 }
  0xe8   : > { %v544_v10 = vpop.f32.mrb[2].mxu0 }
  0xe9   : > { %v547_v11 = vpack.c.bf16 %v542_v8, %v542_v8  ;;  %v1195_v12 = vpop.f32.mrb[3].mxu0 }
  0xeb   : > { %561 = vrot.lane.b32.xlu1 %v547_v11, %s1308_s16  ;;  %553 = vrot.lane.b32.xlu0 %v547_v11, %s1309_s17  ;;  %549 = vst.msk [vmem:[#allocation2] sm:$0xf] %vm548_vm2, %v547_v11 }
  0xef   : > { %566 = vrot.lane.b32.xlu1 %v547_v11, %s1310_s18  ;;  %557 = vrot.lane.b32.xlu0 %v547_v11, %s1311_s19 }
  0xf3   : > { %576 = vrot.lane.b32.xlu1 %v547_v11, %s1312_s20  ;;  %571 = vrot.lane.b32.xlu0 %v547_v11, %s1313_s21 }
  0xf7   : > { %586 = vrot.lane.b32.xlu1 %v547_v11, %s1314_s22  ;;  %581 = vrot.lane.b32.xlu0 %v547_v11, %s1315_s23 }
  0xfb   : > { %596 = vrot.lane.b32.xlu1 %v547_v11, %s1316_s24  ;;  %591 = vrot.lane.b32.xlu0 %v547_v11, %s1317_s25 }
  0xff   : > { %601 = vrot.lane.b32.xlu0 %v547_v11, %s1318_s26 }
 0x15d   : > { %v562_v13 = vpop.permute.xlu1 %561  ;;  %v554_v14 = vpop.permute.xlu0 %553 }
 0x15e   : > { %565 = vst.msk [vmem:[#allocation2 + $0x4] sm:$0xf] %vm548_vm2, %v562_v13  ;;  %556 = vst.msk [vmem:[#allocation3] sm:$0xf] %vm548_vm2, %v554_v14 }
 0x161   : > { %v567_v15 = vpop.permute.xlu1 %566  ;;  %v558_v16 = vpop.permute.xlu0 %557 }
 0x162   : > { %570 = vst.msk [vmem:[#allocation3 + $0x4] sm:$0xf] %vm548_vm2, %v567_v15  ;;  %560 = vst.msk [vmem:[#allocation4] sm:$0xf] %vm548_vm2, %v558_v16 }
 0x165   : > { %v577_v17 = vpop.permute.xlu1 %576  ;;  %v572_v18 = vpop.permute.xlu0 %571 }
 0x166   : > { %580 = vst.msk [vmem:[#allocation2 + $0x8] sm:$0xf] %vm548_vm2, %v577_v17  ;;  %575 = vst.msk [vmem:[#allocation4 + $0x4] sm:$0xf] %vm548_vm2, %v572_v18 }
 0x169   : > { %v587_v19 = vpop.permute.xlu1 %586  ;;  %v582_v20 = vpop.permute.xlu0 %581 }
 0x16a   : > { %590 = vst.msk [vmem:[#allocation4 + $0x8] sm:$0xf] %vm548_vm2, %v587_v19  ;;  %585 = vst.msk [vmem:[#allocation3 + $0x8] sm:$0xf] %vm548_vm2, %v582_v20 }
 0x16d   : > { %v597_v21 = vpop.permute.xlu1 %596  ;;  %v592_v22 = vpop.permute.xlu0 %591 }
 0x16e   : > { %600 = vst.msk [vmem:[#allocation3 + $0xc] sm:$0xf] %vm548_vm2, %v597_v21  ;;  %595 = vst.msk [vmem:[#allocation2 + $0xc] sm:$0xf] %vm548_vm2, %v592_v22 }
 0x171   : > { %v602_v23 = vpop.permute.xlu0 %601 }
 0x172   : > { %605 = vst.msk [vmem:[#allocation4 + $0xc] sm:$0xf] %vm548_vm2, %v602_v23 }
 0x173 LB: >> { %v1319_v24 = vmov 0.0   ;;  %vm1320_vm3 = vmmov 0   ;;  %s1456_s30 = sshll.u32 %s1304_s27, 2  ;;  %vm619_vm4 = vcmask 64512   ;;  %vm692_vm5 = vcmask 1043456   ;;  %s612_s27 = sadd.s32 1, %s1304_s27   ;;  %s1304_s27 = sphi %s1450_s27, %s612_s27  }
 0x174   : >> { %1196 = vmatprep.subr.bf16.mxu0 %v1319_v24  ;;  %1198 = vmatprep.mubr.msk.bf16.mxu0 %vm1320_vm3, %v1319_v24  ;;  %s617_s15 = scalar_lea.vmem [#allocation3], %s1456_s30  ;;  %s614_s16 = scalar_lea.vmem [#allocation2], %s1456_s30 }
 0x175   : >> { %1202 = vmatprep.subr.bf16.mxu1 %v1319_v24  ;;  %1204 = vmatprep.mubr.msk.bf16.mxu1 %vm1320_vm3, %v1319_v24  ;;  %v618_v25 = vld [vmem:[%s617_s15] sm:$0xf]  ;;  %s687_s17 = scalar_lea.vmem [#allocation4], %s1456_s30  ;;  %s738_s18 = scalar_lea.vmem [#allocation5], %s1456_s30 }
 0x176   : >> { %v624_v26 = vsel %vm619_vm4, %v618_v25, 0  ;;  %v615_v27 = vld [vmem:[%s614_s16] sm:$0xf]  ;;  %p609_p4 = scmp.ge.s32.totalorder %s612_s27, 4  }
 0x177   : >> { %1197 = vmatpush3.bf16.xpose.msra.mxu0 %v624_v26  ;;  %s1321_s19 = smov (%p609_p4), 8   ;;  %s1322_s20 = smov (%p609_p4), 24   ;;  %v1276_v55 = vld [vmem:[%s1548_s4] sm:$0xff] (%p609_p4)   ;;  %v1277_v56 = vld [vmem:[%s1548_s4 + $0x8] sm:$0xff] (%p609_p4)   ;;  %vm748_vm6 = vcmask (%p609_p4), 126016   ;;  %vm756_vm7 = vcmask (%p609_p4), 191616  }
 0x178   : > { %1224 = vmatprep.subr.bf16.mxu0 (%p609_p4), %v1306_v1  ;;  %s1323_s25 = smov (%p609_p4), 16   ;;  %vm764_vm8 = vcmask (%p609_p4), 257216   ;;  %v1149_v61 = vld [vmem:[%s1549_s5] ss:$0 sm:$0xff] (%p609_p4)  ;;  %v1281_v24 = vld [vmem:[%s1554_s10 + $0x8] sm:$0xff] (%p609_p4)   ;;  %v1282_v25 = vld [vmem:[%s1554_s10 + $0x10] sm:$0xff] (%p609_p4)  }
 0x179   : >> { %v688_v40 = vld [vmem:[%s687_s17] sm:$0xf]  ;;  %v1283_v26 = vld [vmem:[%s1554_s10 + $0x18] sm:$0xff] (%p609_p4)   ;;  %vm980_vm9 = vcmask (%p609_p4), 523264  }
 0x17a   : >> { %v694_v41 = vsel %vm692_vm5, %v688_v40, 0  ;;  %v1278_v12 = vld [vmem:[%s1552_s8] sm:$0xff] (%p609_p4)  }
 0x17b   : >> { %1203 = vmatpush3.bf16.msra.mxu1 %v694_v41  ;;  %v1153_v17 = vld [vmem:[%s1550_s6] ss:$0 sm:$0xff] (%p609_p4) }
 0x17c   : > { %1208 = vmatprep.subr.bf16.mxu1 (%p609_p4), %v1306_v1  ;;  %v1154_v19 = vld [vmem:[%s1551_s7] ss:$0 sm:$0xff] (%p609_p4) }
 0x17d   : > { %v1280_v23 = vld [vmem:[%s1554_s10] sm:$0xff] (%p609_p4)  }
 0x17e   : >> { %1199 = vmatmul.mubr.msk.bf16.vlgmr.msra.gmra.mrb[0].mxu0 %vm619_vm4, %v615_v27  ;;  %v1155_v27 = vld [vmem:[%s1553_s9] ss:$0 sm:$0xff] (%p609_p4) }
 0x17f   : > { %1232 = vmatprep.mubr.msk.bf16.mxu0 (%p609_p4), %vm1307_vm0, %v1306_v1  ;;  %1225 = vmatpush3.bf16.msra.mxu0 (%p609_p4), %v1280_v23 }
 0x180   : > { %1226 = vmatprep.subr.bf16.mxu0 (%p609_p4), %v1306_v1 }
 0x183   : > { %1227 = vmatpush3.bf16.msra.mxu0 (%p609_p4), %v1281_v24 }
 0x184   : > { %1228 = vmatprep.subr.bf16.mxu0 (%p609_p4), %v1306_v1 }
 0x187   : > { %1229 = vmatpush3.bf16.msra.mxu0 (%p609_p4), %v1282_v25 }
 0x188   : > { %1230 = vmatprep.subr.bf16.mxu0 (%p609_p4), %v1306_v1 }
 0x18b   : > { %1231 = vmatpush3.bf16.msra.mxu0 (%p609_p4), %v1283_v26 }
 0x251   : >> { %v660_v28 = vpop.f32.mrb[0].mxu0 }
 0x252   : >> { %v666_v29 = vmul.f32 0.35355338, %v660_v28  ;;  %v1200_v30 = vpop.f32.mrb[1].mxu0 }
 0x253   : >> { %v663_v31 = vpop.f32.mrb[2].mxu0 }
 0x254   : >> { %v673_v32 = vadd.f32 %v1428_v3, %v666_v29  ;;  %v1201_v33 = vpop.f32.mrb[3].mxu0 }
 0x256   : >> { %v674_v34 = vsel %vm619_vm4, %v673_v32, -inf }
 0x257   : >> { %675 = vmax.xlane.f32.xlu0 %v674_v34 }
 0x2e4   : >> { %v676_v35 = vpop.xlane.xlu0 %675 }
 0x2e5   : >> { %v677_v36 = vsub.f32 %v673_v32, %v676_v35 }
 0x2e7   : >> { %v678_v37 = vmul.f32 1.442695, %v677_v36 }
 0x2e9   : >> { %1272 = vpow2.f32 %v678_v37 }
 0x2f3   : >> { %v1273_v38 = vpop.eup %1272 }
 0x2f4   : >> { %v680_v39 = vsel %vm619_vm4, %v1273_v38, 0.0 }
 0x2f5   : >> { %681 = vadd.xlane.f32.xlu0 %v680_v39 }
 0x382   : >> { %v682_v42 = vpop.xlane.xlu0 %681 }
 0x383   : >> { %1274 = vrcp.f32 %v682_v42  ;;  %v1159_v42 = vld [vmem:[%s1555_s11] ss:$0 sm:$0xff] (%p609_p4) }
 0x38d   : >> { %v1275_v43 = vpop.eup %1274 }
 0x38e   : >> { %v684_v44 = vmul.f32 %v1275_v43, %v1273_v38 }
 0x390   : >> { %v685_v45 = vpack.c.bf16 %v684_v44, %v684_v44 }
 0x392   : >> { %1205 = vmatmul.mubr.msk.bf16.vlgmr.msra.gmra.mrb[0].mxu1 %vm619_vm4, %v685_v45 }
 0x393   : > { %1212 = vmatprep.mubr.msk.bf16.mxu1 (%p609_p4), %vm1307_vm0, %v1306_v1  ;;  %1209 = vmatpush3.bf16.msra.mxu1 (%p609_p4), %v1276_v55 }
 0x394   : > { %1210 = vmatprep.subr.bf16.mxu1 (%p609_p4), %v1306_v1 }
 0x397   : > { %1211 = vmatpush3.bf16.msra.mxu1 (%p609_p4), %v1277_v56 }
 0x398   : > { %1216 = vmatprep.subr.bf16.mxu1 (%p609_p4), %v1306_v1 }
 0x462   : > { %611 = sbr.rel (!%p609_p4) target bundleno = 371 (0x173), region = 132 }
 0x465   : >> { %v730_v46 = vpop.f32.mrb[0].mxu1 }
 0x466   : >> { %v736_v47 = vpack.c.bf16 %v730_v46, %v730_v46  ;;  %v1206_v48 = vpop.f32.mrb[1].mxu1 }
 0x467   : >> { %v733_v49 = vpop.f32.mrb[2].mxu1 }
 0x468   : >> { %739 = vst.msk [vmem:[%s738_s18] sm:$0xf] %vm548_vm2, %v736_v47  ;;  %v1207_v50 = vpop.f32.mrb[3].mxu1 }
 0x46f   : > { %v743_v51 = vld [vmem:[#allocation5 + $0x4] sm:$0xf]  ;;  %v751_v52 = vld [vmem:[#allocation5 + $0x8] sm:$0xf]  ;;  %v759_v53 = vld [vmem:[#allocation5 + $0xc] sm:$0xf] }
 0x470   : > { %745 = vrot.lane.b32.xlu0 %v743_v51, %s1321_s19  ;;  %v740_v54 = vld [vmem:[#allocation5] sm:$0xf]  ;;  %761 = vrot.lane.b32.xlu1 %v759_v53, %s1322_s20 }
 0x471   : > { %741 = vst.msk [vmem:[#allocation6] sm:$0xf] %vm548_vm2, %v740_v54 }
 0x474   : > { %753 = vrot.lane.b32.xlu0 %v751_v52, %s1323_s25 }
 0x4e2   : > { %v746_v57 = vpop.permute.xlu0 %745  ;;  %v762_v58 = vpop.permute.xlu1 %761 }
 0x4e3   : > { %749 = vst.msk [vmem:[#allocation6] sm:$0xf] %vm748_vm6, %v746_v57 }
 0x4e6   : > { %v754_v59 = vpop.permute.xlu0 %753 }
 0x4e7   : > { %757 = vst.msk [vmem:[#allocation6] sm:$0xf] %vm756_vm7, %v754_v59  ;;  %v1165_v59 = vld [vmem:[%s1556_s12] ss:$0 sm:$0xff] }
 0x4e8   : > { %765 = vst.msk [vmem:[#allocation6] sm:$0xf] %vm764_vm8, %v762_v58 }
 0x4ef   : > { %v766_v60 = vld [vmem:[#allocation6] sm:$0xf] }
 0x4f0   : > { %1213 = vmatmul.mubr.msk.bf16.vlgmr.msra.gmra.mrb[0].mxu1 %vm503_vm1, %v766_v60 }
 0x4f1   : > { %1220 = vmatprep.mubr.msk.bf16.mxu1 %vm1307_vm0, %v1306_v1  ;;  %1217 = vmatpush3.bf16.msra.mxu1 %v1278_v12 }
 0x4f2   : > { %1218 = vmatprep.subr.bf16.mxu1 %v1306_v1 }
 0x5c3   : > { %v827_v62 = vpop.f32.mrb[0].mxu1 }
 0x5c4   : > { %v828_v63 = vadd.f32 %v1149_v61, %v827_v62  ;;  %v1214_v0 = vpop.f32.mrb[1].mxu1  ;;  %v1166_v61 = vld [vmem:[%s1557_s13] ss:$0 sm:$0xff] }
 0x5c5   : > { %v830_v2 = vpop.f32.mrb[2].mxu1 }
 0x5c6   : > { %v833_v3 = vadd.f32 %v828_v63, %v1430_v4  ;;  %v1215_v5 = vpop.f32.mrb[3].mxu1  ;;  %v1279_v4 = vld [vmem:[%s1552_s8 + $0x8] sm:$0xff]  }
 0x5c7   : > { %1219 = vmatpush3.bf16.msra.mxu1 %v1279_v4 }
 0x5c8   : > { %v836_v6 = vsel %vm503_vm1, %v833_v3, 0.0 }
 0x5c9   : > { %837 = vadd.xlane.f32.xlu1 %v836_v6 }
 0x656   : > { %v838_v7 = vpop.xlane.xlu1 %837 }
 0x657   : > { %v840_v8 = vmul.f32 0.03125, %v838_v7 }
 0x659   : > { %v841_v9 = vsub.f32 %v833_v3, %v840_v8 }
 0x65b   : > { %v842_v10 = vmul.f32 %v841_v9, %v841_v9 }
 0x65d   : > { %v843_v11 = vsel %vm503_vm1, %v842_v10, 0.0 }
 0x65e   : > { %844 = vadd.xlane.f32.xlu0 %v843_v11 }
 0x6eb   : > { %v845_v13 = vpop.xlane.xlu0 %844 }
 0x6ec   : > { %v846_v14 = vmul.f32 0.03125, %v845_v13 }
 0x6ee   : > { %v847_v15 = vadd.f32 1e-12, %v846_v14 }
 0x6f0   : > { %1284 = vrsqrt.f32 %v847_v15 }
 0x6fa   : > { %v1285_v16 = vpop.eup %1284 }
 0x6fb   : > { %v849_v18 = vmul.f32 %v1285_v16, %v841_v9 }
 0x6fd   : > { %v856_v20 = vmul.f32 %v1153_v17, %v849_v18 }
 0x6ff   : > { %v863_v21 = vadd.f32 %v1154_v19, %v856_v20 }
 0x701   : > { %v864_v22 = vpack.c.bf16 %v863_v21, %v863_v21 }
 0x703   : > { %1221 = vmatmul.mubr.msk.bf16.vlgmr.msra.gmra.mrb[4].mxu1 %vm503_vm1, %v864_v22 }
 0x7d6   : > { %v925_v28 = vpop.f32.mrb[4].mxu1 }
 0x7d7   : > { %v926_v29 = vadd.f32 %v1155_v27, %v925_v28  ;;  %v1222_v30 = vpop.f32.mrb[5].mxu1 }
 0x7d8   : > { %v928_v31 = vpop.f32.mrb[6].mxu1 }
 0x7d9   : > { %v932_v32 = vmul.f32 0.044715, %v926_v29  ;;  %v1223_v33 = vpop.f32.mrb[7].mxu1  ;;  %v931_v39 = vmul.f32 0.5, %v926_v29 }
 0x7db   : > { %v933_v34 = vmul.f32 %v932_v32, %v926_v29 }
 0x7dd   : > { %v934_v35 = vmul.f32 %v933_v34, %v926_v29 }
 0x7df   : > { %v935_v36 = vadd.f32 %v934_v35, %v926_v29 }
 0x7e1   : > { %v936_v37 = vmul.f32 0.7978846, %v935_v36 }
 0x7e3   : > { %1286 = vtanh.f32 %v936_v37 }
 0x7ed   : > { %v1287_v38 = vpop.eup %1286 }
 0x7ee   : > { %v938_v40 = vadd.f32 1.0, %v1287_v38 }
 0x7f0   : > { %v939_v1 = vmul.f32 %v938_v40, %v931_v39 }
 0x7f2   : > { %v940_v41 = vpack.c.bf16 %v939_v1, %v939_v1 }
 0x7f4   : > { %1233 = vmatmul.mubr.msk.bf16.vlgmr.msra.gmra.mrb[0].mxu0 %vm980_vm9, %v940_v41 }
 0x8c7   : > { %v1018_v43 = vpop.f32.mrb[0].mxu0 }
 0x8c8   : > { %v1019_v44 = vadd.f32 %v1159_v42, %v1018_v43  ;;  %v1234_v45 = vpop.f32.mrb[1].mxu0 }
 0x8c9   : > { %v1021_v46 = vpop.f32.mrb[2].mxu0 }
 0x8ca   : > { %v1235_v47 = vpop.f32.mrb[3].mxu0  ;;  %v1024_v48 = vadd.f32 %v1019_v44, %v863_v21 }
 0x8cc   : > { %v1027_v49 = vsel %vm503_vm1, %v1024_v48, 0.0 }
 0x8cd   : > { %1028 = vadd.xlane.f32.xlu0 %v1027_v49 }
 0x95a   : > { %v1029_v50 = vpop.xlane.xlu0 %1028 }
 0x95b   : > { %v1030_v51 = vmul.f32 0.03125, %v1029_v50 }
 0x95d   : > { %v1031_v52 = vsub.f32 %v1024_v48, %v1030_v51 }
 0x95f   : > { %v1032_v53 = vmul.f32 %v1031_v52, %v1031_v52 }
 0x961   : > { %v1033_v54 = vsel %vm503_vm1, %v1032_v53, 0.0 }
 0x962   : > { %1034 = vadd.xlane.f32.xlu1 %v1033_v54 }
 0x9ef   : > { %v1035_v55 = vpop.xlane.xlu1 %1034 }
 0x9f0   : > { %v1036_v56 = vmul.f32 0.03125, %v1035_v55 }
 0x9f2   : > { %v1037_v57 = vadd.f32 1e-12, %v1036_v56 }
 0x9f4   : > { %1288 = vrsqrt.f32 %v1037_v57 }
 0x9fe   : > { %v1289_v58 = vpop.eup %1288 }
 0x9ff   : > { %v1039_v60 = vmul.f32 %v1289_v58, %v1031_v52 }
 0xa01   : > { %v1046_v62 = vmul.f32 %v1165_v59, %v1039_v60 }
 0xa03   : > { %v1053_v63 = vadd.f32 %v1166_v61, %v1046_v62 }
 0xa05   : > { %1054 = vst.msk [vmem:[%s1426_s28] sm:$0xff] %vm503_vm1, %v1053_v63 }
 0xa06 PF: > { %s24_s29 = sadd.s32 1, %s1300_s29  }
 0xa07   : > { %p21_p5 = scmp.ge.s32.totalorder %s24_s29, 4  }
 0xa09   :  { %23 = sbr.rel (!%p21_p5) target bundleno = 1 (0x1), region = 143 }

// kernel: bert2bert_forward.6
= control target key start
LH: loop header
LB: loop body
LE: loop exit
PB: predicated region body
PF: predicated region fallthrough
CT: control target
= control target key end

     0   :  { %s1576_s26 = smov 0   ;;  %s1740_s0 = inlined_call_operand.vmem [shape: f32[2,8,32], index: 0, kind: input, shape index: {}]   ;;  %s1741_s1 = inlined_call_operand.vmem [shape: f32[2,1,8], index: 1, kind: input, shape index: {}]   ;;  %s1742_s2 = inlined_call_operand.vmem [shape: bf16[32,96], index: 2, kind: input, shape index: {}]   ;;  %s1743_s3 = inlined_call_operand.vmem [shape: f32[1,96], index: 3, kind: input, shape index: {}]   ;;  %s1744_s4 = inlined_call_operand.vmem [shape: bf16[32,32], index: 4, kind: input, shape index: {}]   ;;  %s1745_s5 = inlined_call_operand.vmem [shape: f32[1,32], index: 5, kind: input, shape index: {}]   ;;  %s1746_s6 = inlined_call_operand.vmem [shape: f32[1,32], index: 6, kind: input, shape index: {}]   ;;  %s1747_s7 = inlined_call_operand.vmem [shape: f32[1,32], index: 7, kind: input, shape index: {}]   ;;  %s1748_s8 = inlined_call_operand.vmem [shape: bf16[32,64], index: 8, kind: input, shape index: {}]   ;;  %s1749_s9 = inlined_call_operand.vmem [shape: f32[1,64], index: 9, kind: input, shape index: {}]   ;;  %s1750_s10 = inlined_call_operand.vmem [shape: bf16[64,32], index: 10, kind: input, shape index: {}]   ;;  %s1751_s11 = inlined_call_operand.vmem [shape: f32[1,32], index: 11, kind: input, shape index: {}]   ;;  %s1752_s12 = inlined_call_operand.vmem [shape: f32[1,32], index: 12, kind: input, shape index: {}]   ;;  %s1753_s13 = inlined_call_operand.vmem [shape: f32[1,32], index: 13, kind: input, shape index: {}]   ;;  %s1754_s14 = inlined_call_operand.vmem [shape: f32[1,32], index: 14, kind: input, shape index: {}]   ;;  %s1755_s15 = inlined_call_operand.<no memory space> [shape: f32[1,1], index: 15, kind: input, shape index: {}]   ;;  %s1756_s16 = inlined_call_operand.vmem [shape: f32[2,8,32], index: 16, kind: output, shape index: {0}]   ;;  %s1757_s17 = inlined_call_operand.vmem [shape: f32[2,8,1], index: 17, kind: output, shape index: {1}]  }
   0x1   :  { %1758 = sst [smem:[#allocation8_spill]] %s1740_s0  ;;  %v23_v0 = vstv %s1755_s15 }
   0x2   :  { %1759 = sst [smem:[#allocation9_spill]] %s1741_s1  ;;  %24 = vst [vmem:[#allocation7] sm:$0x1] %v23_v0 }
   0x3   :  { %1760 = sst [smem:[#allocation10_spill]] %s1742_s2 }
   0x4 LB: > { %s1282_s27 = sadd.s32 4294967295, %s1459_s26   ;;  %p1286_p0 = scmp.ge.s32.totalorder %s1459_s26, 1  ;;  %s1459_s26 = sphi %s1576_s26, %s30_s26  }
   0x5   : > { %p499_p1 = scmp.lt.s32.totalorder %s1459_s26, 3 }
   0x7   : > { %p500_p2 = pnand %p1286_p0, %p499_p1 }
   0x8   : > { %s1761_s2 = sld [smem:[#allocation10_spill]] (!%p500_p2)  ;;  %v1465_v2 = vmov (!%p500_p2), 0.0   ;;  %vm1466_vm0 = vmmov (!%p500_p2), 0   ;;  %p556_p3 = scmp.lt.s32.totalorder (!%p500_p2), %s1282_s27, 1  ;;  %vm597_vm1 = vcmask (!%p500_p2), 261120   ;;  %vm642_vm2 = vcmask (!%p500_p2), 60416  }
   0x9   : > { %503 = sbr.rel (%p500_p2) target bundleno = 2744 (0xab8), region = 84  ;;  %1343 = vmatprep.subr.bf16.mxu0 (!%p500_p2), %v1465_v2  ;;  %1347 = vmatprep.mubr.msk.bf16.mxu0 (!%p500_p2), %vm1466_vm0, %v1465_v2  ;;  %s1762_s1 = sld [smem:[#allocation9_spill]] (!%p500_p2)  ;;  %v1290_v7 = vld [vmem:[%s1743_s3] ss:$0 sm:$0xff] (!%p500_p2) }
   0xa   : > { %s1763_s23 = sld [smem:[#allocation8_spill]] (!%p500_p2)  ;;  %s1467_s19 = smov (!%p500_p2), 120  }
   0xb   : > { %s1470_s21 = smov (!%p500_p2), 64   ;;  %s1471_s22 = smov (!%p500_p2), 112  }
   0xc   : > { %s1474_s25 = smov (!%p500_p2), 80   ;;  %s1475_s28 = smov (!%p500_p2), 72  }
   0xd   : > { %s1476_s15 = smov (!%p500_p2), 104   ;;  %s1477_s0 = smov (!%p500_p2), 40  }
   0xe   : > { %v1425_v1 = vld [vmem:[%s1761_s2] sm:$0xff] (!%p500_p2)   ;;  %v1426_v3 = vld [vmem:[%s1761_s2 + $0x8] sm:$0xff] (!%p500_p2)  }
   0xf   : > { %1344 = vmatpush3.bf16.msra.mxu0 (!%p500_p2), %v1425_v1 }
  0x10   : > { %1345 = vmatprep.subr.bf16.mxu0 %v1465_v2  ;;  %s1765_s27 = smov (!%p556_p3, %s1282_s27), 1 }
  0x11   : > { %s1594_s30 = sshll.u32 %s1765_s27, 3  ;;  %s562_s20 = scalar_lea.vmem %s1762_s1, %s1765_s27 }
  0x12   : > { %s559_s24 = scalar_lea.vmem %s1763_s23, %s1594_s30  ;;  %s566_s29 = scalar_lea.vmem %s1756_s16, %s1594_s30  ;;  %v1607_v4 = vld [vmem:[%s562_s20] ss:$0 sm:$0xff] }
  0x13   : > { %1346 = vmatpush3.bf16.msra.mxu0 %v1426_v3  ;;  %s570_s2 = scalar_lea.vmem %s1757_s17, %s1594_s30  ;;  %v1613_v5 = vld [vmem:[%s559_s24] sm:$0xff]  ;;  %s1468_s1 = smov 96  }
  0x14   : > { %v573_v6 = vpack.c.bf16 %v1613_v5, %v1613_v5  ;;  %s1469_s20 = smov 88   ;;  %s1472_s23 = smov 56  }
  0x15   : > { %s1473_s24 = smov 48   ;;  %s1633_s27 = smov 0  }
  0x16   : > { %1348 = vmatmul.mubr.msk.bf16.vlgmr.msra.gmra.mrb[0].mxu0 %vm597_vm1, %v573_v6 }
  0xe9   : > { %v635_v8 = vpop.f32.mrb[0].mxu0 }
  0xea   : > { %v636_v9 = vadd.f32 %v1290_v7, %v635_v8  ;;  %v1349_v10 = vpop.f32.mrb[1].mxu0 }
  0xeb   : > { %v638_v11 = vpop.f32.mrb[2].mxu0 }
  0xec   : > { %v641_v12 = vpack.c.bf16 %v636_v9, %v636_v9  ;;  %v1350_v13 = vpop.f32.mrb[3].mxu0 }
  0xee   : > { %655 = vrot.lane.b32.xlu1 %v641_v12, %s1467_s19  ;;  %647 = vrot.lane.b32.xlu0 %v641_v12, %s1468_s1  ;;  %643 = vst.msk [vmem:[#allocation2] sm:$0xf] %vm642_vm2, %v641_v12 }
  0xf2   : > { %660 = vrot.lane.b32.xlu1 %v641_v12, %s1469_s20  ;;  %651 = vrot.lane.b32.xlu0 %v641_v12, %s1470_s21 }
  0xf6   : > { %670 = vrot.lane.b32.xlu1 %v641_v12, %s1471_s22  ;;  %665 = vrot.lane.b32.xlu0 %v641_v12, %s1472_s23 }
  0xfa   : > { %680 = vrot.lane.b32.xlu1 %v641_v12, %s1473_s24  ;;  %675 = vrot.lane.b32.xlu0 %v641_v12, %s1474_s25 }
  0xfe   : > { %690 = vrot.lane.b32.xlu1 %v641_v12, %s1475_s28  ;;  %685 = vrot.lane.b32.xlu0 %v641_v12, %s1476_s15 }
 0x102   : > { %695 = vrot.lane.b32.xlu0 %v641_v12, %s1477_s0 }
 0x160   : > { %v656_v14 = vpop.permute.xlu1 %655  ;;  %v648_v15 = vpop.permute.xlu0 %647 }
 0x161   : > { %659 = vst.msk [vmem:[#allocation2 + $0x4] sm:$0xf] %vm642_vm2, %v656_v14  ;;  %650 = vst.msk [vmem:[#allocation3] sm:$0xf] %vm642_vm2, %v648_v15 }
 0x164   : > { %v661_v16 = vpop.permute.xlu1 %660  ;;  %v652_v17 = vpop.permute.xlu0 %651 }
 0x165   : > { %664 = vst.msk [vmem:[#allocation3 + $0x4] sm:$0xf] %vm642_vm2, %v661_v16  ;;  %654 = vst.msk [vmem:[#allocation4] sm:$0xf] %vm642_vm2, %v652_v17 }
 0x168   : > { %v671_v18 = vpop.permute.xlu1 %670  ;;  %v666_v19 = vpop.permute.xlu0 %665 }
 0x169   : > { %674 = vst.msk [vmem:[#allocation2 + $0x8] sm:$0xf] %vm642_vm2, %v671_v18  ;;  %669 = vst.msk [vmem:[#allocation4 + $0x4] sm:$0xf] %vm642_vm2, %v666_v19 }
 0x16c   : > { %v681_v20 = vpop.permute.xlu1 %680  ;;  %v676_v21 = vpop.permute.xlu0 %675 }
 0x16d   : > { %684 = vst.msk [vmem:[#allocation4 + $0x8] sm:$0xf] %vm642_vm2, %v681_v20  ;;  %679 = vst.msk [vmem:[#allocation3 + $0x8] sm:$0xf] %vm642_vm2, %v676_v21 }
 0x170   : > { %v691_v22 = vpop.permute.xlu1 %690  ;;  %v686_v23 = vpop.permute.xlu0 %685 }
 0x171   : > { %694 = vst.msk [vmem:[#allocation3 + $0xc] sm:$0xf] %vm642_vm2, %v691_v22  ;;  %689 = vst.msk [vmem:[#allocation2 + $0xc] sm:$0xf] %vm642_vm2, %v686_v23 }
 0x174   : > { %v696_v24 = vpop.permute.xlu0 %695 }
 0x175   : > { %699 = vst.msk [vmem:[#allocation4 + $0xc] sm:$0xf] %vm642_vm2, %v696_v24 }
 0x176 LB: >> { %v1478_v25 = vmov 0.0   ;;  %vm1479_vm3 = vmmov 0   ;;  %s1639_s18 = sshll.u32 %s1463_s27, 2  ;;  %vm713_vm4 = vcmask 64512   ;;  %vm786_vm5 = vcmask 1043456   ;;  %s706_s27 = sadd.s32 1, %s1463_s27   ;;  %s1463_s27 = sphi %s1633_s27, %s706_s27  }
 0x177   : >> { %1351 = vmatprep.subr.bf16.mxu0 %v1478_v25  ;;  %1353 = vmatprep.mubr.msk.bf16.mxu0 %vm1479_vm3, %v1478_v25  ;;  %s711_s19 = scalar_lea.vmem [#allocation3], %s1639_s18  ;;  %s708_s1 = scalar_lea.vmem [#allocation2], %s1639_s18 }
 0x178   : >> { %1357 = vmatprep.subr.bf16.mxu1 %v1478_v25  ;;  %1359 = vmatprep.mubr.msk.bf16.mxu1 %vm1479_vm3, %v1478_v25  ;;  %v712_v26 = vld [vmem:[%s711_s19] sm:$0xf]  ;;  %s781_s20 = scalar_lea.vmem [#allocation4], %s1639_s18  ;;  %s832_s21 = scalar_lea.vmem [#allocation5], %s1639_s18 }
 0x179   : >> { %v718_v27 = vsel %vm713_vm4, %v712_v26, 0  ;;  %v709_v28 = vld [vmem:[%s708_s1] sm:$0xf]  ;;  %p703_p4 = scmp.ge.s32.totalorder %s706_s27, 4  }
 0x17a   : >> { %1352 = vmatpush3.bf16.xpose.msra.mxu0 %v718_v27  ;;  %s1480_s22 = smov (%p703_p4), 8   ;;  %s1481_s23 = smov (%p703_p4), 24   ;;  %v1431_v56 = vld [vmem:[%s1744_s4] sm:$0xff] (%p703_p4)   ;;  %v1432_v57 = vld [vmem:[%s1744_s4 + $0x8] sm:$0xff] (%p703_p4)   ;;  %vm842_vm6 = vcmask (%p703_p4), 126016   ;;  %vm850_vm7 = vcmask (%p703_p4), 191616  }
 0x17b   : > { %1379 = vmatprep.subr.bf16.mxu0 (%p703_p4), %v1465_v2  ;;  %s1482_s0 = smov (%p703_p4), 16   ;;  %vm858_vm8 = vcmask (%p703_p4), 257216   ;;  %v1302_v62 = vld [vmem:[%s1745_s5] ss:$0 sm:$0xff] (%p703_p4)  ;;  %v1436_v25 = vld [vmem:[%s1750_s10 + $0x8] sm:$0xff] (%p703_p4)   ;;  %v1437_v26 = vld [vmem:[%s1750_s10 + $0x10] sm:$0xff] (%p703_p4)  }
 0x17c   : >> { %v782_v41 = vld [vmem:[%s781_s20] sm:$0xf]  ;;  %v1438_v27 = vld [vmem:[%s1750_s10 + $0x18] sm:$0xff] (%p703_p4)   ;;  %vm1074_vm9 = vcmask (%p703_p4), 523264   ;;  %vm1174_vm10 = vcmask (%p703_p4), 7168  }
 0x17d   : >> { %v788_v42 = vsel %vm786_vm5, %v782_v41, 0  ;;  %v1433_v13 = vld [vmem:[%s1748_s8] sm:$0xff] (%p703_p4)  }
 0x17e   : >> { %1358 = vmatpush3.bf16.msra.mxu1 %v788_v42  ;;  %v1306_v18 = vld [vmem:[%s1746_s6] ss:$0 sm:$0xff] (%p703_p4) }
 0x17f   : > { %1363 = vmatprep.subr.bf16.mxu1 (%p703_p4), %v1465_v2  ;;  %v1307_v20 = vld [vmem:[%s1747_s7] ss:$0 sm:$0xff] (%p703_p4) }
 0x180   : > { %v1435_v24 = vld [vmem:[%s1750_s10] sm:$0xff] (%p703_p4)  }
 0x181   : >> { %1354 = vmatmul.mubr.msk.bf16.vlgmr.msra.gmra.mrb[0].mxu0 %vm713_vm4, %v709_v28  ;;  %v1308_v28 = vld [vmem:[%s1749_s9] ss:$0 sm:$0xff] (%p703_p4) }
 0x182   : > { %1387 = vmatprep.mubr.msk.bf16.mxu0 (%p703_p4), %vm1466_vm0, %v1465_v2  ;;  %1380 = vmatpush3.bf16.msra.mxu0 (%p703_p4), %v1435_v24 }
 0x183   : > { %1381 = vmatprep.subr.bf16.mxu0 (%p703_p4), %v1465_v2 }
 0x186   : > { %1382 = vmatpush3.bf16.msra.mxu0 (%p703_p4), %v1436_v25 }
 0x187   : > { %1383 = vmatprep.subr.bf16.mxu0 (%p703_p4), %v1465_v2 }
 0x18a   : > { %1384 = vmatpush3.bf16.msra.mxu0 (%p703_p4), %v1437_v26 }
 0x18b   : > { %1385 = vmatprep.subr.bf16.mxu0 (%p703_p4), %v1465_v2 }
 0x18e   : > { %1386 = vmatpush3.bf16.msra.mxu0 (%p703_p4), %v1438_v27 }
 0x254   : >> { %v754_v29 = vpop.f32.mrb[0].mxu0 }
 0x255   : >> { %v760_v30 = vmul.f32 0.35355338, %v754_v29  ;;  %v1355_v31 = vpop.f32.mrb[1].mxu0 }
 0x256   : >> { %v757_v32 = vpop.f32.mrb[2].mxu0 }
 0x257   : >> { %v767_v33 = vadd.f32 %v1607_v4, %v760_v30  ;;  %v1356_v34 = vpop.f32.mrb[3].mxu0 }
 0x259   : >> { %v768_v35 = vsel %vm713_vm4, %v767_v33, -inf }
 0x25a   : >> { %769 = vmax.xlane.f32.xlu0 %v768_v35 }
 0x2e7   : >> { %v770_v36 = vpop.xlane.xlu0 %769 }
 0x2e8   : >> { %v771_v37 = vsub.f32 %v767_v33, %v770_v36 }
 0x2ea   : >> { %v772_v38 = vmul.f32 1.442695, %v771_v37 }
 0x2ec   : >> { %1427 = vpow2.f32 %v772_v38 }
 0x2f6   : >> { %v1428_v39 = vpop.eup %1427 }
 0x2f7   : >> { %v774_v40 = vsel %vm713_vm4, %v1428_v39, 0.0 }
 0x2f8   : >> { %775 = vadd.xlane.f32.xlu0 %v774_v40 }
 0x385   : >> { %v776_v43 = vpop.xlane.xlu0 %775 }
 0x386   : >> { %1429 = vrcp.f32 %v776_v43  ;;  %v1312_v43 = vld [vmem:[%s1751_s11] ss:$0 sm:$0xff] (%p703_p4) }
 0x390   : >> { %v1430_v44 = vpop.eup %1429 }
 0x391   : >> { %v778_v45 = vmul.f32 %v1430_v44, %v1428_v39 }
 0x393   : >> { %v779_v46 = vpack.c.bf16 %v778_v45, %v778_v45 }
 0x395   : >> { %1360 = vmatmul.mubr.msk.bf16.vlgmr.msra.gmra.mrb[0].mxu1 %vm713_vm4, %v779_v46 }
 0x396   : > { %1367 = vmatprep.mubr.msk.bf16.mxu1 (%p703_p4), %vm1466_vm0, %v1465_v2  ;;  %1364 = vmatpush3.bf16.msra.mxu1 (%p703_p4), %v1431_v56 }
 0x397   : > { %1365 = vmatprep.subr.bf16.mxu1 (%p703_p4), %v1465_v2 }
 0x39a   : > { %1366 = vmatpush3.bf16.msra.mxu1 (%p703_p4), %v1432_v57 }
 0x39b   : > { %1371 = vmatprep.subr.bf16.mxu1 (%p703_p4), %v1465_v2 }
 0x465   : > { %705 = sbr.rel (!%p703_p4) target bundleno = 374 (0x176), region = 152 }
 0x468   : >> { %v824_v47 = vpop.f32.mrb[0].mxu1 }
 0x469   : >> { %v830_v48 = vpack.c.bf16 %v824_v47, %v824_v47  ;;  %v1361_v49 = vpop.f32.mrb[1].mxu1 }
 0x46a   : >> { %v827_v50 = vpop.f32.mrb[2].mxu1 }
 0x46b   : >> { %833 = vst.msk [vmem:[%s832_s21] sm:$0xf] %vm642_vm2, %v830_v48  ;;  %v1362_v51 = vpop.f32.mrb[3].mxu1 }
 0x472   : > { %v837_v52 = vld [vmem:[#allocation5 + $0x4] sm:$0xf]  ;;  %v845_v53 = vld [vmem:[#allocation5 + $0x8] sm:$0xf]  ;;  %v853_v54 = vld [vmem:[#allocation5 + $0xc] sm:$0xf] }
 0x473   : > { %839 = vrot.lane.b32.xlu0 %v837_v52, %s1480_s22  ;;  %v834_v55 = vld [vmem:[#allocation5] sm:$0xf]  ;;  %855 = vrot.lane.b32.xlu1 %v853_v54, %s1481_s23 }
 0x474   : > { %835 = vst.msk [vmem:[#allocation6] sm:$0xf] %vm642_vm2, %v834_v55 }
 0x477   : > { %847 = vrot.lane.b32.xlu0 %v845_v53, %s1482_s0 }
 0x4e5   : > { %v840_v58 = vpop.permute.xlu0 %839  ;;  %v856_v59 = vpop.permute.xlu1 %855 }
 0x4e6   : > { %843 = vst.msk [vmem:[#allocation6] sm:$0xf] %vm842_vm6, %v840_v58 }
 0x4e9   : > { %v848_v60 = vpop.permute.xlu0 %847 }
 0x4ea   : > { %851 = vst.msk [vmem:[#allocation6] sm:$0xf] %vm850_vm7, %v848_v60  ;;  %v1318_v60 = vld [vmem:[%s1752_s12] ss:$0 sm:$0xff] }
 0x4eb   : > { %859 = vst.msk [vmem:[#allocation6] sm:$0xf] %vm858_vm8, %v856_v59 }
 0x4f2   : > { %v860_v61 = vld [vmem:[#allocation6] sm:$0xf] }
 0x4f3   : > { %1368 = vmatmul.mubr.msk.bf16.vlgmr.msra.gmra.mrb[0].mxu1 %vm597_vm1, %v860_v61 }
 0x4f4   : > { %1375 = vmatprep.mubr.msk.bf16.mxu1 %vm1466_vm0, %v1465_v2  ;;  %1372 = vmatpush3.bf16.msra.mxu1 %v1433_v13 }
 0x4f5   : > { %1373 = vmatprep.subr.bf16.mxu1 %v1465_v2 }
 0x5c6   : > { %v921_v63 = vpop.f32.mrb[0].mxu1 }
 0x5c7   : > { %v922_v0 = vadd.f32 %v1302_v62, %v921_v63  ;;  %v1369_v1 = vpop.f32.mrb[1].mxu1  ;;  %v1319_v62 = vld [vmem:[%s1753_s13] ss:$0 sm:$0xff] }
 0x5c8   : > { %v924_v3 = vpop.f32.mrb[2].mxu1 }
 0x5c9   : > { %v927_v4 = vadd.f32 %v922_v0, %v1613_v5  ;;  %v1370_v6 = vpop.f32.mrb[3].mxu1  ;;  %v1434_v5 = vld [vmem:[%s1748_s8 + $0x8] sm:$0xff]   ;;  %v1320_v0 = vld [vmem:[%s1754_s14] ss:$0 sm:$0xff] }
 0x5ca   : > { %1374 = vmatpush3.bf16.msra.mxu1 %v1434_v5  ;;  %v1321_v6 = vld [vmem:[#allocation7] ss:$0 sm:$0xff] }
 0x5cb   : > { %v930_v7 = vsel %vm597_vm1, %v927_v4, 0.0 }
 0x5cc   : > { %931 = vadd.xlane.f32.xlu1 %v930_v7 }
 0x659   : > { %v932_v8 = vpop.xlane.xlu1 %931 }
 0x65a   : > { %v934_v9 = vmul.f32 0.03125, %v932_v8 }
 0x65c   : > { %v935_v10 = vsub.f32 %v927_v4, %v934_v9 }
 0x65e   : > { %v936_v11 = vmul.f32 %v935_v10, %v935_v10 }
 0x660   : > { %v937_v12 = vsel %vm597_vm1, %v936_v11, 0.0 }
 0x661   : > { %938 = vadd.xlane.f32.xlu0 %v937_v12 }
 0x6ee   : > { %v939_v14 = vpop.xlane.xlu0 %938 }
 0x6ef   : > { %v940_v15 = vmul.f32 0.03125, %v939_v14 }
 0x6f1   : > { %v941_v16 = vadd.f32 1e-12, %v940_v15 }
 0x6f3   : > { %1439 = vrsqrt.f32 %v941_v16 }
 0x6fd   : > { %v1440_v17 = vpop.eup %1439 }
 0x6fe   : > { %v943_v19 = vmul.f32 %v1440_v17, %v935_v10 }
 0x700   : > { %v950_v21 = vmul.f32 %v1306_v18, %v943_v19 }
 0x702   : > { %v957_v22 = vadd.f32 %v1307_v20, %v950_v21 }
 0x704   : > { %v958_v23 = vpack.c.bf16 %v957_v22, %v957_v22 }
 0x706   : > { %1376 = vmatmul.mubr.msk.bf16.vlgmr.msra.gmra.mrb[4].mxu1 %vm597_vm1, %v958_v23 }
 0x7d9   : > { %v1019_v29 = vpop.f32.mrb[4].mxu1 }
 0x7da   : > { %v1020_v30 = vadd.f32 %v1308_v28, %v1019_v29  ;;  %v1377_v31 = vpop.f32.mrb[5].mxu1 }
 0x7db   : > { %v1022_v32 = vpop.f32.mrb[6].mxu1 }
 0x7dc   : > { %v1026_v33 = vmul.f32 0.044715, %v1020_v30  ;;  %v1378_v34 = vpop.f32.mrb[7].mxu1  ;;  %v1025_v40 = vmul.f32 0.5, %v1020_v30 }
 0x7de   : > { %v1027_v35 = vmul.f32 %v1026_v33, %v1020_v30 }
 0x7e0   : > { %v1028_v36 = vmul.f32 %v1027_v35, %v1020_v30 }
 0x7e2   : > { %v1029_v37 = vadd.f32 %v1028_v36, %v1020_v30 }
 0x7e4   : > { %v1030_v38 = vmul.f32 0.7978846, %v1029_v37 }
 0x7e6   : > { %1441 = vtanh.f32 %v1030_v38 }
 0x7f0   : > { %v1442_v39 = vpop.eup %1441 }
 0x7f1   : > { %v1032_v41 = vadd.f32 1.0, %v1442_v39 }
 0x7f3   : > { %v1033_v2 = vmul.f32 %v1032_v41, %v1025_v40 }
 0x7f5   : > { %v1034_v42 = vpack.c.bf16 %v1033_v2, %v1033_v2 }
 0x7f7   : > { %1388 = vmatmul.mubr.msk.bf16.vlgmr.msra.gmra.mrb[0].mxu0 %vm1074_vm9, %v1034_v42 }
 0x8ca   : > { %v1112_v44 = vpop.f32.mrb[0].mxu0 }
 0x8cb   : > { %v1113_v45 = vadd.f32 %v1312_v43, %v1112_v44  ;;  %v1389_v46 = vpop.f32.mrb[1].mxu0 }
 0x8cc   : > { %v1115_v47 = vpop.f32.mrb[2].mxu0 }
 0x8cd   : > { %v1390_v48 = vpop.f32.mrb[3].mxu0  ;;  %v1118_v49 = vadd.f32 %v1113_v45, %v957_v22 }
 0x8cf   : > { %v1121_v50 = vsel %vm597_vm1, %v1118_v49, 0.0 }
 0x8d0   : > { %1122 = vadd.xlane.f32.xlu0 %v1121_v50 }
 0x95d   : > { %v1123_v51 = vpop.xlane.xlu0 %1122 }
 0x95e   : > { %v1124_v52 = vmul.f32 0.03125, %v1123_v51 }
 0x960   : > { %v1125_v53 = vsub.f32 %v1118_v49, %v1124_v52 }
 0x962   : > { %v1126_v54 = vmul.f32 %v1125_v53, %v1125_v53 }
 0x964   : > { %v1127_v55 = vsel %vm597_vm1, %v1126_v54, 0.0 }
 0x965   : > { %1128 = vadd.xlane.f32.xlu1 %v1127_v55 }
 0x9f2   : > { %v1129_v56 = vpop.xlane.xlu1 %1128 }
 0x9f3   : > { %v1130_v57 = vmul.f32 0.03125, %v1129_v56 }
 0x9f5   : > { %v1131_v58 = vadd.f32 1e-12, %v1130_v57 }
 0x9f7   : > { %1443 = vrsqrt.f32 %v1131_v58 }
 0xa01   : > { %v1444_v59 = vpop.eup %1443 }
 0xa02   : > { %v1133_v61 = vmul.f32 %v1444_v59, %v1125_v53 }
 0xa04   : > { %v1140_v63 = vmul.f32 %v1318_v60, %v1133_v61 }
 0xa06   : > { %v1147_v1 = vadd.f32 %v1319_v62, %v1140_v63 }
 0xa08   : > { %v1156_v3 = vmul.f32 %v1320_v0, %v1147_v1  ;;  %1148 = vst.msk [vmem:[%s566_s29] sm:$0xff] %vm597_vm1, %v1147_v1 }
 0xa0a   : > { %v1157_v4 = vsel %vm597_vm1, %v1156_v3, 0.0 }
 0xa0b   : > { %1158 = vadd.xlane.f32.xlu0 %v1157_v4 }
 0xa98   : > { %v1159_v7 = vpop.xlane.xlu0 %1158 }
 0xa99   : > { %v1167_v8 = vadd.f32 %v1321_v6, %v1159_v7 }
 0xa9b   : > { %v1168_v9 = vsub.f32 0.0, %v1167_v8 }
 0xa9d   : > { %v1169_v10 = vmul.f32 1.442695, %v1168_v9 }
 0xa9f   : > { %1445 = vpow2.f32 %v1169_v10 }
 0xaa9   : > { %v1446_v11 = vpop.eup %1445 }
 0xaaa   : > { %v1171_v12 = vadd.f32 1.0, %v1446_v11 }
 0xaac   : > { %1447 = vrcp.f32 %v1171_v12 }
 0xab6   : > { %v1448_v13 = vpop.eup %1447 }
 0xab7   : > { %1175 = vst.msk [vmem:[%s570_s2] sm:$0xff] %vm1174_vm10, %v1448_v13 }
 0xab8 PF: > { %s30_s26 = sadd.s32 1, %s1459_s26  }
 0xab9   : > { %p27_p5 = scmp.ge.s32.totalorder %s30_s26, 4  }
 0xabb   :  { %29 = sbr.rel (!%p27_p5) target bundleno = 4 (0x4), region = 163 }

</bundles_post_ra>
